<compile_context>
chip_gen: v5e
topology: v5e:2x2
jax: 0.10.0
libtpu: 0.0.40
codegen_flags: <defaults>
</compile_context>

<pallas_src>
import jax
import jax.numpy as jnp
from jax.experimental import pallas as pl
from jax.experimental.pallas import tpu as pltpu

# ---- hyperparameters (scaled down from the reference dim=200 -> 32) --------
DIM = 32
DIM_PAD = 128             # lane-dense feature width (full 128-lane vregs)
LAYER_HIDDEN = 6
LAYER_OUTPUT = 3
LAYER_PREDICT = 3
NADDUCT = 4
N_ATOM_TYPES = 7
PAD_VALUE = 1.0e6         # same pad value as the torch code
EPS = 1e-12               # F.normalize eps
MXU_DTYPE = jnp.bfloat16  # MXU operand dtype; accumulation stays float32

assert DIM + NADDUCT <= DIM_PAD


# ---------------------------------------------------------------------------
# Single fused kernel: hidden layers + readout + segment sum + predict + head
# ---------------------------------------------------------------------------
def mgnn_fused_kernel(x0_ref, d_ref, gam_ref, wa_ref, ba_ref,
                      wo_ref, bo_ref, seg_ref, add_ref,
                      wp_ref, bp_ref, wq_ref, bq_ref, out_ref):
    def mx(a, b):
        # bf16 MXU operands, f32 accumulation
        return jnp.dot(a.astype(MXU_DTYPE), b.astype(MXU_DTYPE),
                       preferred_element_type=jnp.float32)

    x = x0_ref[...]                        # [N, DP] padded atom embeddings
    d = d_ref[...]                         # [N, N] block-diagonal distances
    d2 = d * d                             # hoisted out of the layer loop

    # ---- 6 message-passing layers, fully unrolled in one invocation -------
    for l in range(LAYER_HIDDEN):
        m = jnp.exp(-gam_ref[l] * d2)      # M[i,j] = exp(-gamma[j] * d_ij^2)
        h = jnp.maximum(mx(x, wa_ref[l]) + ba_ref[l], 0.0)
        x = h + mx(m, h)
        # F.normalize(x, p=2, dim=1)  (padded lanes are exactly 0)
        norm = jnp.sqrt(jnp.sum(x * x, axis=1, keepdims=True))
        x = x / jnp.maximum(norm, EPS)

    # ---- output MLP --------------------------------------------------------
    for l in range(LAYER_OUTPUT):
        x = jnp.maximum(mx(x, wo_ref[l]) + bo_ref[l], 0.0)

    # ---- per-molecule sum (segment-indicator matmul) + adduct "concat" -----
    # adducts were pre-placed into the zero padding lanes [DIM, DIM+NADDUCT),
    # so torch.cat((mv, adducts), 1) is just an add.
    v = mx(seg_ref[...], x) + add_ref[...]          # [B, DP]

    # ---- prediction MLP -----------------------------------------------------
    for l in range(LAYER_PREDICT):
        v = jnp.maximum(mx(v, wp_ref[l]) + bp_ref[l], 0.0)

    # ---- property head ------------------------------------------------------
    out_ref[...] = mx(v, wq_ref[...]) + bq_ref[...]  # [B, 1]


# ---------------------------------------------------------------------------
# One-time parameter preparation (transpose + lane padding), hoisted out of
# the forward pass.
# ---------------------------------------------------------------------------
def _pad_last(x, width):
    return jnp.pad(x, [(0, 0)] * (x.ndim - 1) + [(0, width - x.shape[-1])])


def _pad_last2(x, rows, cols):
    return jnp.pad(x, [(0, 0)] * (x.ndim - 2)
                   + [(0, rows - x.shape[-2]), (0, cols - x.shape[-1])])


def prepare_params(params):
    dp = DIM_PAD
    f32 = jnp.float32
    return {
        "embed": _pad_last(params["embed"].astype(f32), dp),            # [A, DP]
        "gamma": params["gamma"].astype(f32),                           # [LH, A, 1]
        "wa": _pad_last2(jnp.transpose(params["W_atom"], (0, 2, 1)).astype(f32), dp, dp),
        "ba": _pad_last(params["b_atom"].astype(f32), dp)[:, None, :],  # [LH,1,DP]
        "wo": _pad_last2(jnp.transpose(params["W_out"], (0, 2, 1)).astype(f32), dp, dp),
        "bo": _pad_last(params["b_out"].astype(f32), dp)[:, None, :],   # [LO,1,DP]
        "wp": _pad_last2(jnp.transpose(params["W_pred"], (0, 2, 1)).astype(f32), dp, dp),
        "bp": _pad_last(params["b_pred"].astype(f32), dp)[:, None, :],  # [LP,1,DP]
        "wq": _pad_last2(params["W_prop"].T.astype(f32), dp, 1),        # [DP, 1]
        "bq": params["b_prop"].astype(f32).reshape(1, 1),               # [1, 1]
    }


# ---------------------------------------------------------------------------
# Forward pass: tiny gathers / pads as JAX glue, everything else in one kernel
# ---------------------------------------------------------------------------
@jax.jit
def forward(prepped, atoms, dist, seg, adducts):
    b = seg.shape[0]
    x0 = prepped["embed"][atoms]                              # [N, DP] gather
    gam = prepped["gamma"][:, atoms, 0][:, None, :]           # [LH, 1, N]
    # place adducts into lanes [DIM, DIM+NADDUCT) of the padded feature dim
    add_emb = jnp.pad(adducts.astype(jnp.float32),
                      ((0, 0), (DIM, DIM_PAD - DIM - NADDUCT)))  # [B, DP]

    vspec = lambda: pl.BlockSpec(memory_space=pltpu.MemorySpace.VMEM)
    return pl.pallas_call(
        mgnn_fused_kernel,
        out_shape=jax.ShapeDtypeStruct((b, 1), jnp.float32),
        in_specs=[vspec() for _ in range(13)],
        out_specs=vspec(),
    )(x0, dist.astype(jnp.float32), gam,
      prepped["wa"], prepped["ba"],
      prepped["wo"], prepped["bo"],
      seg.astype(jnp.float32), add_emb,
      prepped["wp"], prepped["bp"],
      prepped["wq"], prepped["bq"])


# ---------------------------------------------------------------------------
# Pure-JAX reference (mirrors the torch forward).  mxu_dtype=None gives the
# exact f32 torch semantics; mxu_dtype=bfloat16 mirrors the kernel's MXU
# operand rounding (f32 accumulation) for a tight check.
# ---------------------------------------------------------------------------
def reference_forward(params, atoms, dist, seg, adducts, mxu_dtype=None):
    def dot(a, b):
        if mxu_dtype is None:
            return jnp.dot(a, b, preferred_element_type=jnp.float32)
        return jnp.dot(a.astype(mxu_dtype), b.astype(mxu_dtype),
                       preferred_element_type=jnp.float32)

    x = params["embed"][atoms]
    for l in range(LAYER_HIDDEN):
        g = params["gamma"][l][atoms, 0]
        m = jnp.exp(-g[None, :] * dist ** 2)
        h = jax.nn.relu(dot(x, params["W_atom"][l].T) + params["b_atom"][l])
        x = h + dot(m, h)
        x = x / jnp.maximum(jnp.linalg.norm(x, axis=1, keepdims=True), EPS)
    for l in range(LAYER_OUTPUT):
        x = jax.nn.relu(dot(x, params["W_out"][l].T) + params["b_out"][l])
    mv = dot(seg, x)
    mv = jnp.concatenate([mv, adducts], axis=1)
    for l in range(LAYER_PREDICT):
        mv = jax.nn.relu(dot(mv, params["W_pred"][l].T) + params["b_pred"][l])
    return dot(mv, params["W_prop"].T) + params["b_prop"]


# ---------------------------------------------------------------------------
if __name__ == "__main__":
    key = jax.random.PRNGKey(0)
    ks = jax.random.split(key, 20)
    d2 = DIM + NADDUCT

    # Deterministic synthetic parameters (shapes from the module __init__).
    params = {
        "embed": 0.1 * jax.random.normal(ks[0], (N_ATOM_TYPES, DIM), jnp.float32),
        # keep gammas positive so exp(-gamma * d^2) underflows on the pad value
        "gamma": 0.5
        + 0.1 * jnp.abs(jax.random.normal(ks[1], (LAYER_HIDDEN, N_ATOM_TYPES, 1),
                                          jnp.float32)),
        "W_atom": 0.1 * jax.random.normal(ks[2], (LAYER_HIDDEN, DIM, DIM), jnp.float32),
        "b_atom": 0.1 * jax.random.normal(ks[3], (LAYER_HIDDEN, DIM), jnp.float32),
        "W_out": 0.1 * jax.random.normal(ks[4], (LAYER_OUTPUT, DIM, DIM), jnp.float32),
        "b_out": 0.1 * jax.random.normal(ks[5], (LAYER_OUTPUT, DIM), jnp.float32),
        "W_pred": 0.1 * jax.random.normal(ks[6], (LAYER_PREDICT, d2, d2), jnp.float32),
        "b_pred": 0.1 * jax.random.normal(ks[7], (LAYER_PREDICT, d2), jnp.float32),
        "W_prop": 0.1 * jax.random.normal(ks[8], (1, d2), jnp.float32),
        "b_prop": 0.1 * jax.random.normal(ks[9], (1,), jnp.float32),
    }

    # Synthetic batch of 3 molecules (16 atoms total -> multiple of 8 sublanes).
    mol_sizes = (5, 7, 4)
    n_total = sum(mol_sizes)
    n_mol = len(mol_sizes)

    atoms = jax.random.randint(ks[10], (n_total,), 0, N_ATOM_TYPES)

    # Block-diagonal distance matrix padded with PAD_VALUE (as in self.pad).
    dist = jnp.full((n_total, n_total), PAD_VALUE, jnp.float32)
    off = 0
    dkeys = jax.random.split(ks[11], n_mol)
    for i, s in enumerate(mol_sizes):
        dm = jax.random.uniform(dkeys[i], (s, s), jnp.float32, 0.5, 3.0)
        dm = 0.5 * (dm + dm.T) * (1.0 - jnp.eye(s, dtype=jnp.float32))
        dist = dist.at[off:off + s, off:off + s].set(dm)
        off += s

    # Segment indicator matrix ([B, N]) implementing self.sum's split+sum.
    seg = jnp.zeros((n_mol, n_total), jnp.float32)
    off = 0
    for b, s in enumerate(mol_sizes):
        seg = seg.at[b, off:off + s].set(1.0)
        off += s

    adducts = jax.random.normal(ks[12], (n_mol, NADDUCT), jnp.float32)

    prepped = prepare_params(params)
    out = forward(prepped, atoms, dist, seg, adducts)
    out = jax.block_until_ready(out)
    assert out.shape == (n_mol, 1)

    # Tight check: reference with the same bf16 MXU-operand rounding.
    ref_bf16 = reference_forward(params, atoms, dist, seg, adducts,
                                 mxu_dtype=MXU_DTYPE)
    assert jnp.allclose(out, ref_bf16, rtol=1e-4, atol=1e-4), (out, ref_bf16)

    # Semantics check vs. pure-f32 torch-mirroring reference (loose tolerance
    # only accounts for bf16 MXU operands in the kernel).
    ref_f32 = reference_forward(params, atoms, dist, seg, adducts, mxu_dtype=None)
    assert jnp.allclose(out, ref_f32, rtol=5e-2, atol=5e-2), (out, ref_f32)

    print("KERNEL_OK")
</pallas_src>

<mosaic_0001>
module attributes {stable_mosaic.version = 11 : i64} {
  func.func @mgnn_fused_kernel(%arg0: memref<16x128xf32, #tpu.memory_space<vmem>>, %arg1: memref<16x16xf32, #tpu.memory_space<vmem>>, %arg2: memref<6x1x16xf32, #tpu.memory_space<vmem>>, %arg3: memref<6x128x128xf32, #tpu.memory_space<vmem>>, %arg4: memref<6x1x128xf32, #tpu.memory_space<vmem>>, %arg5: memref<3x128x128xf32, #tpu.memory_space<vmem>>, %arg6: memref<3x1x128xf32, #tpu.memory_space<vmem>>, %arg7: memref<3x16xf32, #tpu.memory_space<vmem>>, %arg8: memref<3x128xf32, #tpu.memory_space<vmem>>, %arg9: memref<3x128x128xf32, #tpu.memory_space<vmem>>, %arg10: memref<3x1x128xf32, #tpu.memory_space<vmem>>, %arg11: memref<128x1xf32, #tpu.memory_space<vmem>>, %arg12: memref<1x1xf32, #tpu.memory_space<vmem>>, %arg13: memref<3x1xf32, #tpu.memory_space<vmem>>) attributes {dimension_semantics = [], scalar_prefetch = 0 : i64, scratch_operands = 0 : i64, tpu.core_type = #tpu.core_type<tc>} {
    %c0 = arith.constant 0 : index
    %c0_0 = arith.constant 0 : index
    %0 = vector.load %arg0[%c0, %c0_0] : memref<16x128xf32, #tpu.memory_space<vmem>>, vector<16x128xf32>
    %c0_1 = arith.constant 0 : index
    %c0_2 = arith.constant 0 : index
    %1 = vector.load %arg1[%c0_1, %c0_2] : memref<16x16xf32, #tpu.memory_space<vmem>>, vector<16x16xf32>
    %2 = arith.mulf %1, %1 : vector<16x16xf32>
    %c0_3 = arith.constant 0 : index
    %c0_4 = arith.constant 0 : index
    %c0_5 = arith.constant 0 : index
    %3 = vector.load %arg2[%c0_3, %c0_4, %c0_5] : memref<6x1x16xf32, #tpu.memory_space<vmem>>, vector<1x1x16xf32>
    %4 = vector.shape_cast %3 : vector<1x1x16xf32> to vector<1x16xf32>
    %cst = arith.constant 0.000000e+00 : f32
    %5 = vector.broadcast %cst : f32 to vector<1x16xf32>
    %6 = arith.subf %5, %4 : vector<1x16xf32>
    %7 = vector.broadcast %6 : vector<1x16xf32> to vector<16x16xf32>
    %8 = arith.mulf %7, %2 : vector<16x16xf32>
    %9 = math.exp %8 : vector<16x16xf32>
    %c0_6 = arith.constant 0 : index
    %c0_7 = arith.constant 0 : index
    %c0_8 = arith.constant 0 : index
    %10 = vector.load %arg3[%c0_6, %c0_7, %c0_8] : memref<6x128x128xf32, #tpu.memory_space<vmem>>, vector<1x128x128xf32>
    %11 = vector.shape_cast %10 : vector<1x128x128xf32> to vector<128x128xf32>
    %12 = arith.truncf %0 : vector<16x128xf32> to vector<16x128xbf16>
    %13 = arith.truncf %11 : vector<128x128xf32> to vector<128x128xbf16>
    %cst_9 = arith.constant dense<0.000000e+00> : vector<16x128xf32>
    %14 = tpu.matmul %12, %13, %cst_9 {dimension_numbers = #tpu.dot_dimension_numbers<[1], [0], [0], [1], [0, 0, 1, 1], [], []>} : vector<16x128xbf16>, vector<128x128xbf16>, vector<16x128xf32> -> vector<16x128xf32>
    %c0_10 = arith.constant 0 : index
    %c0_11 = arith.constant 0 : index
    %c0_12 = arith.constant 0 : index
    %15 = vector.load %arg4[%c0_10, %c0_11, %c0_12] : memref<6x1x128xf32, #tpu.memory_space<vmem>>, vector<1x1x128xf32>
    %16 = vector.shape_cast %15 : vector<1x1x128xf32> to vector<1x128xf32>
    %17 = vector.broadcast %16 : vector<1x128xf32> to vector<16x128xf32>
    %18 = arith.addf %14, %17 : vector<16x128xf32>
    %cst_13 = arith.constant 0.000000e+00 : f32
    %19 = vector.broadcast %cst_13 : f32 to vector<16x128xf32>
    %20 = arith.maximumf %18, %19 : vector<16x128xf32>
    %21 = arith.truncf %9 : vector<16x16xf32> to vector<16x16xbf16>
    %22 = arith.truncf %20 : vector<16x128xf32> to vector<16x128xbf16>
    %cst_14 = arith.constant dense<0.000000e+00> : vector<16x128xf32>
    %23 = tpu.matmul %21, %22, %cst_14 {dimension_numbers = #tpu.dot_dimension_numbers<[1], [0], [0], [1], [0, 0, 1, 1], [], []>} : vector<16x16xbf16>, vector<16x128xbf16>, vector<16x128xf32> -> vector<16x128xf32>
    %24 = arith.addf %20, %23 : vector<16x128xf32>
    %25 = arith.mulf %24, %24 : vector<16x128xf32>
    %cst_15 = arith.constant dense<0.000000e+00> : vector<16xf32>
    %26 = vector.multi_reduction <add>, %25, %cst_15 [1] : vector<16x128xf32> to vector<16xf32>
    %27 = vector.shape_cast %26 : vector<16xf32> to vector<16x1xf32>
    %28 = math.sqrt %27 : vector<16x1xf32>
    %cst_16 = arith.constant 9.99999996E-13 : f32
    %29 = vector.broadcast %cst_16 : f32 to vector<16x1xf32>
    %30 = arith.maximumf %28, %29 : vector<16x1xf32>
    %31 = vector.broadcast %30 : vector<16x1xf32> to vector<16x128xf32>
    %32 = arith.divf %24, %31 : vector<16x128xf32>
    %c1 = arith.constant 1 : index
    %c0_17 = arith.constant 0 : index
    %c0_18 = arith.constant 0 : index
    %33 = vector.load %arg2[%c1, %c0_17, %c0_18] : memref<6x1x16xf32, #tpu.memory_space<vmem>>, vector<1x1x16xf32>
    %34 = vector.shape_cast %33 : vector<1x1x16xf32> to vector<1x16xf32>
    %cst_19 = arith.constant 0.000000e+00 : f32
    %35 = vector.broadcast %cst_19 : f32 to vector<1x16xf32>
    %36 = arith.subf %35, %34 : vector<1x16xf32>
    %37 = vector.broadcast %36 : vector<1x16xf32> to vector<16x16xf32>
    %38 = arith.mulf %37, %2 : vector<16x16xf32>
    %39 = math.exp %38 : vector<16x16xf32>
    %c1_20 = arith.constant 1 : index
    %c0_21 = arith.constant 0 : index
    %c0_22 = arith.constant 0 : index
    %40 = vector.load %arg3[%c1_20, %c0_21, %c0_22] : memref<6x128x128xf32, #tpu.memory_space<vmem>>, vector<1x128x128xf32>
    %41 = vector.shape_cast %40 : vector<1x128x128xf32> to vector<128x128xf32>
    %42 = arith.truncf %32 : vector<16x128xf32> to vector<16x128xbf16>
    %43 = arith.truncf %41 : vector<128x128xf32> to vector<128x128xbf16>
    %cst_23 = arith.constant dense<0.000000e+00> : vector<16x128xf32>
    %44 = tpu.matmul %42, %43, %cst_23 {dimension_numbers = #tpu.dot_dimension_numbers<[1], [0], [0], [1], [0, 0, 1, 1], [], []>} : vector<16x128xbf16>, vector<128x128xbf16>, vector<16x128xf32> -> vector<16x128xf32>
    %c1_24 = arith.constant 1 : index
    %c0_25 = arith.constant 0 : index
    %c0_26 = arith.constant 0 : index
    %45 = vector.load %arg4[%c1_24, %c0_25, %c0_26] : memref<6x1x128xf32, #tpu.memory_space<vmem>>, vector<1x1x128xf32>
    %46 = vector.shape_cast %45 : vector<1x1x128xf32> to vector<1x128xf32>
    %47 = vector.broadcast %46 : vector<1x128xf32> to vector<16x128xf32>
    %48 = arith.addf %44, %47 : vector<16x128xf32>
    %cst_27 = arith.constant 0.000000e+00 : f32
    %49 = vector.broadcast %cst_27 : f32 to vector<16x128xf32>
    %50 = arith.maximumf %48, %49 : vector<16x128xf32>
    %51 = arith.truncf %39 : vector<16x16xf32> to vector<16x16xbf16>
    %52 = arith.truncf %50 : vector<16x128xf32> to vector<16x128xbf16>
    %cst_28 = arith.constant dense<0.000000e+00> : vector<16x128xf32>
    %53 = tpu.matmul %51, %52, %cst_28 {dimension_numbers = #tpu.dot_dimension_numbers<[1], [0], [0], [1], [0, 0, 1, 1], [], []>} : vector<16x16xbf16>, vector<16x128xbf16>, vector<16x128xf32> -> vector<16x128xf32>
    %54 = arith.addf %50, %53 : vector<16x128xf32>
    %55 = arith.mulf %54, %54 : vector<16x128xf32>
    %cst_29 = arith.constant dense<0.000000e+00> : vector<16xf32>
    %56 = vector.multi_reduction <add>, %55, %cst_29 [1] : vector<16x128xf32> to vector<16xf32>
    %57 = vector.shape_cast %56 : vector<16xf32> to vector<16x1xf32>
    %58 = math.sqrt %57 : vector<16x1xf32>
    %cst_30 = arith.constant 9.99999996E-13 : f32
    %59 = vector.broadcast %cst_30 : f32 to vector<16x1xf32>
    %60 = arith.maximumf %58, %59 : vector<16x1xf32>
    %61 = vector.broadcast %60 : vector<16x1xf32> to vector<16x128xf32>
    %62 = arith.divf %54, %61 : vector<16x128xf32>
    %c2 = arith.constant 2 : index
    %c0_31 = arith.constant 0 : index
    %c0_32 = arith.constant 0 : index
    %63 = vector.load %arg2[%c2, %c0_31, %c0_32] : memref<6x1x16xf32, #tpu.memory_space<vmem>>, vector<1x1x16xf32>
    %64 = vector.shape_cast %63 : vector<1x1x16xf32> to vector<1x16xf32>
    %cst_33 = arith.constant 0.000000e+00 : f32
    %65 = vector.broadcast %cst_33 : f32 to vector<1x16xf32>
    %66 = arith.subf %65, %64 : vector<1x16xf32>
    %67 = vector.broadcast %66 : vector<1x16xf32> to vector<16x16xf32>
    %68 = arith.mulf %67, %2 : vector<16x16xf32>
    %69 = math.exp %68 : vector<16x16xf32>
    %c2_34 = arith.constant 2 : index
    %c0_35 = arith.constant 0 : index
    %c0_36 = arith.constant 0 : index
    %70 = vector.load %arg3[%c2_34, %c0_35, %c0_36] : memref<6x128x128xf32, #tpu.memory_space<vmem>>, vector<1x128x128xf32>
    %71 = vector.shape_cast %70 : vector<1x128x128xf32> to vector<128x128xf32>
    %72 = arith.truncf %62 : vector<16x128xf32> to vector<16x128xbf16>
    %73 = arith.truncf %71 : vector<128x128xf32> to vector<128x128xbf16>
    %cst_37 = arith.constant dense<0.000000e+00> : vector<16x128xf32>
    %74 = tpu.matmul %72, %73, %cst_37 {dimension_numbers = #tpu.dot_dimension_numbers<[1], [0], [0], [1], [0, 0, 1, 1], [], []>} : vector<16x128xbf16>, vector<128x128xbf16>, vector<16x128xf32> -> vector<16x128xf32>
    %c2_38 = arith.constant 2 : index
    %c0_39 = arith.constant 0 : index
    %c0_40 = arith.constant 0 : index
    %75 = vector.load %arg4[%c2_38, %c0_39, %c0_40] : memref<6x1x128xf32, #tpu.memory_space<vmem>>, vector<1x1x128xf32>
    %76 = vector.shape_cast %75 : vector<1x1x128xf32> to vector<1x128xf32>
    %77 = vector.broadcast %76 : vector<1x128xf32> to vector<16x128xf32>
    %78 = arith.addf %74, %77 : vector<16x128xf32>
    %cst_41 = arith.constant 0.000000e+00 : f32
    %79 = vector.broadcast %cst_41 : f32 to vector<16x128xf32>
    %80 = arith.maximumf %78, %79 : vector<16x128xf32>
    %81 = arith.truncf %69 : vector<16x16xf32> to vector<16x16xbf16>
    %82 = arith.truncf %80 : vector<16x128xf32> to vector<16x128xbf16>
    %cst_42 = arith.constant dense<0.000000e+00> : vector<16x128xf32>
    %83 = tpu.matmul %81, %82, %cst_42 {dimension_numbers = #tpu.dot_dimension_numbers<[1], [0], [0], [1], [0, 0, 1, 1], [], []>} : vector<16x16xbf16>, vector<16x128xbf16>, vector<16x128xf32> -> vector<16x128xf32>
    %84 = arith.addf %80, %83 : vector<16x128xf32>
    %85 = arith.mulf %84, %84 : vector<16x128xf32>
    %cst_43 = arith.constant dense<0.000000e+00> : vector<16xf32>
    %86 = vector.multi_reduction <add>, %85, %cst_43 [1] : vector<16x128xf32> to vector<16xf32>
    %87 = vector.shape_cast %86 : vector<16xf32> to vector<16x1xf32>
    %88 = math.sqrt %87 : vector<16x1xf32>
    %cst_44 = arith.constant 9.99999996E-13 : f32
    %89 = vector.broadcast %cst_44 : f32 to vector<16x1xf32>
    %90 = arith.maximumf %88, %89 : vector<16x1xf32>
    %91 = vector.broadcast %90 : vector<16x1xf32> to vector<16x128xf32>
    %92 = arith.divf %84, %91 : vector<16x128xf32>
    %c3 = arith.constant 3 : index
    %c0_45 = arith.constant 0 : index
    %c0_46 = arith.constant 0 : index
    %93 = vector.load %arg2[%c3, %c0_45, %c0_46] : memref<6x1x16xf32, #tpu.memory_space<vmem>>, vector<1x1x16xf32>
    %94 = vector.shape_cast %93 : vector<1x1x16xf32> to vector<1x16xf32>
    %cst_47 = arith.constant 0.000000e+00 : f32
    %95 = vector.broadcast %cst_47 : f32 to vector<1x16xf32>
    %96 = arith.subf %95, %94 : vector<1x16xf32>
    %97 = vector.broadcast %96 : vector<1x16xf32> to vector<16x16xf32>
    %98 = arith.mulf %97, %2 : vector<16x16xf32>
    %99 = math.exp %98 : vector<16x16xf32>
    %c3_48 = arith.constant 3 : index
    %c0_49 = arith.constant 0 : index
    %c0_50 = arith.constant 0 : index
    %100 = vector.load %arg3[%c3_48, %c0_49, %c0_50] : memref<6x128x128xf32, #tpu.memory_space<vmem>>, vector<1x128x128xf32>
    %101 = vector.shape_cast %100 : vector<1x128x128xf32> to vector<128x128xf32>
    %102 = arith.truncf %92 : vector<16x128xf32> to vector<16x128xbf16>
    %103 = arith.truncf %101 : vector<128x128xf32> to vector<128x128xbf16>
    %cst_51 = arith.constant dense<0.000000e+00> : vector<16x128xf32>
    %104 = tpu.matmul %102, %103, %cst_51 {dimension_numbers = #tpu.dot_dimension_numbers<[1], [0], [0], [1], [0, 0, 1, 1], [], []>} : vector<16x128xbf16>, vector<128x128xbf16>, vector<16x128xf32> -> vector<16x128xf32>
    %c3_52 = arith.constant 3 : index
    %c0_53 = arith.constant 0 : index
    %c0_54 = arith.constant 0 : index
    %105 = vector.load %arg4[%c3_52, %c0_53, %c0_54] : memref<6x1x128xf32, #tpu.memory_space<vmem>>, vector<1x1x128xf32>
    %106 = vector.shape_cast %105 : vector<1x1x128xf32> to vector<1x128xf32>
    %107 = vector.broadcast %106 : vector<1x128xf32> to vector<16x128xf32>
    %108 = arith.addf %104, %107 : vector<16x128xf32>
    %cst_55 = arith.constant 0.000000e+00 : f32
    %109 = vector.broadcast %cst_55 : f32 to vector<16x128xf32>
    %110 = arith.maximumf %108, %109 : vector<16x128xf32>
    %111 = arith.truncf %99 : vector<16x16xf32> to vector<16x16xbf16>
    %112 = arith.truncf %110 : vector<16x128xf32> to vector<16x128xbf16>
    %cst_56 = arith.constant dense<0.000000e+00> : vector<16x128xf32>
    %113 = tpu.matmul %111, %112, %cst_56 {dimension_numbers = #tpu.dot_dimension_numbers<[1], [0], [0], [1], [0, 0, 1, 1], [], []>} : vector<16x16xbf16>, vector<16x128xbf16>, vector<16x128xf32> -> vector<16x128xf32>
    %114 = arith.addf %110, %113 : vector<16x128xf32>
    %115 = arith.mulf %114, %114 : vector<16x128xf32>
    %cst_57 = arith.constant dense<0.000000e+00> : vector<16xf32>
    %116 = vector.multi_reduction <add>, %115, %cst_57 [1] : vector<16x128xf32> to vector<16xf32>
    %117 = vector.shape_cast %116 : vector<16xf32> to vector<16x1xf32>
    %118 = math.sqrt %117 : vector<16x1xf32>
    %cst_58 = arith.constant 9.99999996E-13 : f32
    %119 = vector.broadcast %cst_58 : f32 to vector<16x1xf32>
    %120 = arith.maximumf %118, %119 : vector<16x1xf32>
    %121 = vector.broadcast %120 : vector<16x1xf32> to vector<16x128xf32>
    %122 = arith.divf %114, %121 : vector<16x128xf32>
    %c4 = arith.constant 4 : index
    %c0_59 = arith.constant 0 : index
    %c0_60 = arith.constant 0 : index
    %123 = vector.load %arg2[%c4, %c0_59, %c0_60] : memref<6x1x16xf32, #tpu.memory_space<vmem>>, vector<1x1x16xf32>
    %124 = vector.shape_cast %123 : vector<1x1x16xf32> to vector<1x16xf32>
    %cst_61 = arith.constant 0.000000e+00 : f32
    %125 = vector.broadcast %cst_61 : f32 to vector<1x16xf32>
    %126 = arith.subf %125, %124 : vector<1x16xf32>
    %127 = vector.broadcast %126 : vector<1x16xf32> to vector<16x16xf32>
    %128 = arith.mulf %127, %2 : vector<16x16xf32>
    %129 = math.exp %128 : vector<16x16xf32>
    %c4_62 = arith.constant 4 : index
    %c0_63 = arith.constant 0 : index
    %c0_64 = arith.constant 0 : index
    %130 = vector.load %arg3[%c4_62, %c0_63, %c0_64] : memref<6x128x128xf32, #tpu.memory_space<vmem>>, vector<1x128x128xf32>
    %131 = vector.shape_cast %130 : vector<1x128x128xf32> to vector<128x128xf32>
    %132 = arith.truncf %122 : vector<16x128xf32> to vector<16x128xbf16>
    %133 = arith.truncf %131 : vector<128x128xf32> to vector<128x128xbf16>
    %cst_65 = arith.constant dense<0.000000e+00> : vector<16x128xf32>
    %134 = tpu.matmul %132, %133, %cst_65 {dimension_numbers = #tpu.dot_dimension_numbers<[1], [0], [0], [1], [0, 0, 1, 1], [], []>} : vector<16x128xbf16>, vector<128x128xbf16>, vector<16x128xf32> -> vector<16x128xf32>
    %c4_66 = arith.constant 4 : index
    %c0_67 = arith.constant 0 : index
    %c0_68 = arith.constant 0 : index
    %135 = vector.load %arg4[%c4_66, %c0_67, %c0_68] : memref<6x1x128xf32, #tpu.memory_space<vmem>>, vector<1x1x128xf32>
    %136 = vector.shape_cast %135 : vector<1x1x128xf32> to vector<1x128xf32>
    %137 = vector.broadcast %136 : vector<1x128xf32> to vector<16x128xf32>
    %138 = arith.addf %134, %137 : vector<16x128xf32>
    %cst_69 = arith.constant 0.000000e+00 : f32
    %139 = vector.broadcast %cst_69 : f32 to vector<16x128xf32>
    %140 = arith.maximumf %138, %139 : vector<16x128xf32>
    %141 = arith.truncf %129 : vector<16x16xf32> to vector<16x16xbf16>
    %142 = arith.truncf %140 : vector<16x128xf32> to vector<16x128xbf16>
    %cst_70 = arith.constant dense<0.000000e+00> : vector<16x128xf32>
    %143 = tpu.matmul %141, %142, %cst_70 {dimension_numbers = #tpu.dot_dimension_numbers<[1], [0], [0], [1], [0, 0, 1, 1], [], []>} : vector<16x16xbf16>, vector<16x128xbf16>, vector<16x128xf32> -> vector<16x128xf32>
    %144 = arith.addf %140, %143 : vector<16x128xf32>
    %145 = arith.mulf %144, %144 : vector<16x128xf32>
    %cst_71 = arith.constant dense<0.000000e+00> : vector<16xf32>
    %146 = vector.multi_reduction <add>, %145, %cst_71 [1] : vector<16x128xf32> to vector<16xf32>
    %147 = vector.shape_cast %146 : vector<16xf32> to vector<16x1xf32>
    %148 = math.sqrt %147 : vector<16x1xf32>
    %cst_72 = arith.constant 9.99999996E-13 : f32
    %149 = vector.broadcast %cst_72 : f32 to vector<16x1xf32>
    %150 = arith.maximumf %148, %149 : vector<16x1xf32>
    %151 = vector.broadcast %150 : vector<16x1xf32> to vector<16x128xf32>
    %152 = arith.divf %144, %151 : vector<16x128xf32>
    %c5 = arith.constant 5 : index
    %c0_73 = arith.constant 0 : index
    %c0_74 = arith.constant 0 : index
    %153 = vector.load %arg2[%c5, %c0_73, %c0_74] : memref<6x1x16xf32, #tpu.memory_space<vmem>>, vector<1x1x16xf32>
    %154 = vector.shape_cast %153 : vector<1x1x16xf32> to vector<1x16xf32>
    %cst_75 = arith.constant 0.000000e+00 : f32
    %155 = vector.broadcast %cst_75 : f32 to vector<1x16xf32>
    %156 = arith.subf %155, %154 : vector<1x16xf32>
    %157 = vector.broadcast %156 : vector<1x16xf32> to vector<16x16xf32>
    %158 = arith.mulf %157, %2 : vector<16x16xf32>
    %159 = math.exp %158 : vector<16x16xf32>
    %c5_76 = arith.constant 5 : index
    %c0_77 = arith.constant 0 : index
    %c0_78 = arith.constant 0 : index
    %160 = vector.load %arg3[%c5_76, %c0_77, %c0_78] : memref<6x128x128xf32, #tpu.memory_space<vmem>>, vector<1x128x128xf32>
    %161 = vector.shape_cast %160 : vector<1x128x128xf32> to vector<128x128xf32>
    %162 = arith.truncf %152 : vector<16x128xf32> to vector<16x128xbf16>
    %163 = arith.truncf %161 : vector<128x128xf32> to vector<128x128xbf16>
    %cst_79 = arith.constant dense<0.000000e+00> : vector<16x128xf32>
    %164 = tpu.matmul %162, %163, %cst_79 {dimension_numbers = #tpu.dot_dimension_numbers<[1], [0], [0], [1], [0, 0, 1, 1], [], []>} : vector<16x128xbf16>, vector<128x128xbf16>, vector<16x128xf32> -> vector<16x128xf32>
    %c5_80 = arith.constant 5 : index
    %c0_81 = arith.constant 0 : index
    %c0_82 = arith.constant 0 : index
    %165 = vector.load %arg4[%c5_80, %c0_81, %c0_82] : memref<6x1x128xf32, #tpu.memory_space<vmem>>, vector<1x1x128xf32>
    %166 = vector.shape_cast %165 : vector<1x1x128xf32> to vector<1x128xf32>
    %167 = vector.broadcast %166 : vector<1x128xf32> to vector<16x128xf32>
    %168 = arith.addf %164, %167 : vector<16x128xf32>
    %cst_83 = arith.constant 0.000000e+00 : f32
    %169 = vector.broadcast %cst_83 : f32 to vector<16x128xf32>
    %170 = arith.maximumf %168, %169 : vector<16x128xf32>
    %171 = arith.truncf %159 : vector<16x16xf32> to vector<16x16xbf16>
    %172 = arith.truncf %170 : vector<16x128xf32> to vector<16x128xbf16>
    %cst_84 = arith.constant dense<0.000000e+00> : vector<16x128xf32>
    %173 = tpu.matmul %171, %172, %cst_84 {dimension_numbers = #tpu.dot_dimension_numbers<[1], [0], [0], [1], [0, 0, 1, 1], [], []>} : vector<16x16xbf16>, vector<16x128xbf16>, vector<16x128xf32> -> vector<16x128xf32>
    %174 = arith.addf %170, %173 : vector<16x128xf32>
    %175 = arith.mulf %174, %174 : vector<16x128xf32>
    %cst_85 = arith.constant dense<0.000000e+00> : vector<16xf32>
    %176 = vector.multi_reduction <add>, %175, %cst_85 [1] : vector<16x128xf32> to vector<16xf32>
    %177 = vector.shape_cast %176 : vector<16xf32> to vector<16x1xf32>
    %178 = math.sqrt %177 : vector<16x1xf32>
    %cst_86 = arith.constant 9.99999996E-13 : f32
    %179 = vector.broadcast %cst_86 : f32 to vector<16x1xf32>
    %180 = arith.maximumf %178, %179 : vector<16x1xf32>
    %181 = vector.broadcast %180 : vector<16x1xf32> to vector<16x128xf32>
    %182 = arith.divf %174, %181 : vector<16x128xf32>
    %c0_87 = arith.constant 0 : index
    %c0_88 = arith.constant 0 : index
    %c0_89 = arith.constant 0 : index
    %183 = vector.load %arg5[%c0_87, %c0_88, %c0_89] : memref<3x128x128xf32, #tpu.memory_space<vmem>>, vector<1x128x128xf32>
    %184 = vector.shape_cast %183 : vector<1x128x128xf32> to vector<128x128xf32>
    %185 = arith.truncf %182 : vector<16x128xf32> to vector<16x128xbf16>
    %186 = arith.truncf %184 : vector<128x128xf32> to vector<128x128xbf16>
    %cst_90 = arith.constant dense<0.000000e+00> : vector<16x128xf32>
    %187 = tpu.matmul %185, %186, %cst_90 {dimension_numbers = #tpu.dot_dimension_numbers<[1], [0], [0], [1], [0, 0, 1, 1], [], []>} : vector<16x128xbf16>, vector<128x128xbf16>, vector<16x128xf32> -> vector<16x128xf32>
    %c0_91 = arith.constant 0 : index
    %c0_92 = arith.constant 0 : index
    %c0_93 = arith.constant 0 : index
    %188 = vector.load %arg6[%c0_91, %c0_92, %c0_93] : memref<3x1x128xf32, #tpu.memory_space<vmem>>, vector<1x1x128xf32>
    %189 = vector.shape_cast %188 : vector<1x1x128xf32> to vector<1x128xf32>
    %190 = vector.broadcast %189 : vector<1x128xf32> to vector<16x128xf32>
    %191 = arith.addf %187, %190 : vector<16x128xf32>
    %cst_94 = arith.constant 0.000000e+00 : f32
    %192 = vector.broadcast %cst_94 : f32 to vector<16x128xf32>
    %193 = arith.maximumf %191, %192 : vector<16x128xf32>
    %c1_95 = arith.constant 1 : index
    %c0_96 = arith.constant 0 : index
    %c0_97 = arith.constant 0 : index
    %194 = vector.load %arg5[%c1_95, %c0_96, %c0_97] : memref<3x128x128xf32, #tpu.memory_space<vmem>>, vector<1x128x128xf32>
    %195 = vector.shape_cast %194 : vector<1x128x128xf32> to vector<128x128xf32>
    %196 = arith.truncf %193 : vector<16x128xf32> to vector<16x128xbf16>
    %197 = arith.truncf %195 : vector<128x128xf32> to vector<128x128xbf16>
    %cst_98 = arith.constant dense<0.000000e+00> : vector<16x128xf32>
    %198 = tpu.matmul %196, %197, %cst_98 {dimension_numbers = #tpu.dot_dimension_numbers<[1], [0], [0], [1], [0, 0, 1, 1], [], []>} : vector<16x128xbf16>, vector<128x128xbf16>, vector<16x128xf32> -> vector<16x128xf32>
    %c1_99 = arith.constant 1 : index
    %c0_100 = arith.constant 0 : index
    %c0_101 = arith.constant 0 : index
    %199 = vector.load %arg6[%c1_99, %c0_100, %c0_101] : memref<3x1x128xf32, #tpu.memory_space<vmem>>, vector<1x1x128xf32>
    %200 = vector.shape_cast %199 : vector<1x1x128xf32> to vector<1x128xf32>
    %201 = vector.broadcast %200 : vector<1x128xf32> to vector<16x128xf32>
    %202 = arith.addf %198, %201 : vector<16x128xf32>
    %cst_102 = arith.constant 0.000000e+00 : f32
    %203 = vector.broadcast %cst_102 : f32 to vector<16x128xf32>
    %204 = arith.maximumf %202, %203 : vector<16x128xf32>
    %c2_103 = arith.constant 2 : index
    %c0_104 = arith.constant 0 : index
    %c0_105 = arith.constant 0 : index
    %205 = vector.load %arg5[%c2_103, %c0_104, %c0_105] : memref<3x128x128xf32, #tpu.memory_space<vmem>>, vector<1x128x128xf32>
    %206 = vector.shape_cast %205 : vector<1x128x128xf32> to vector<128x128xf32>
    %207 = arith.truncf %204 : vector<16x128xf32> to vector<16x128xbf16>
    %208 = arith.truncf %206 : vector<128x128xf32> to vector<128x128xbf16>
    %cst_106 = arith.constant dense<0.000000e+00> : vector<16x128xf32>
    %209 = tpu.matmul %207, %208, %cst_106 {dimension_numbers = #tpu.dot_dimension_numbers<[1], [0], [0], [1], [0, 0, 1, 1], [], []>} : vector<16x128xbf16>, vector<128x128xbf16>, vector<16x128xf32> -> vector<16x128xf32>
    %c2_107 = arith.constant 2 : index
    %c0_108 = arith.constant 0 : index
    %c0_109 = arith.constant 0 : index
    %210 = vector.load %arg6[%c2_107, %c0_108, %c0_109] : memref<3x1x128xf32, #tpu.memory_space<vmem>>, vector<1x1x128xf32>
    %211 = vector.shape_cast %210 : vector<1x1x128xf32> to vector<1x128xf32>
    %212 = vector.broadcast %211 : vector<1x128xf32> to vector<16x128xf32>
    %213 = arith.addf %209, %212 : vector<16x128xf32>
    %cst_110 = arith.constant 0.000000e+00 : f32
    %214 = vector.broadcast %cst_110 : f32 to vector<16x128xf32>
    %215 = arith.maximumf %213, %214 : vector<16x128xf32>
    %c0_111 = arith.constant 0 : index
    %c0_112 = arith.constant 0 : index
    %216 = vector.load %arg7[%c0_111, %c0_112] : memref<3x16xf32, #tpu.memory_space<vmem>>, vector<3x16xf32>
    %217 = arith.truncf %216 : vector<3x16xf32> to vector<3x16xbf16>
    %218 = arith.truncf %215 : vector<16x128xf32> to vector<16x128xbf16>
    %cst_113 = arith.constant dense<0.000000e+00> : vector<3x128xf32>
    %219 = tpu.matmul %217, %218, %cst_113 {dimension_numbers = #tpu.dot_dimension_numbers<[1], [0], [0], [1], [0, 0, 1, 1], [], []>} : vector<3x16xbf16>, vector<16x128xbf16>, vector<3x128xf32> -> vector<3x128xf32>
    %c0_114 = arith.constant 0 : index
    %c0_115 = arith.constant 0 : index
    %220 = vector.load %arg8[%c0_114, %c0_115] : memref<3x128xf32, #tpu.memory_space<vmem>>, vector<3x128xf32>
    %221 = arith.addf %219, %220 : vector<3x128xf32>
    %c0_116 = arith.constant 0 : index
    %c0_117 = arith.constant 0 : index
    %c0_118 = arith.constant 0 : index
    %222 = vector.load %arg9[%c0_116, %c0_117, %c0_118] : memref<3x128x128xf32, #tpu.memory_space<vmem>>, vector<1x128x128xf32>
    %223 = vector.shape_cast %222 : vector<1x128x128xf32> to vector<128x128xf32>
    %224 = arith.truncf %221 : vector<3x128xf32> to vector<3x128xbf16>
    %225 = arith.truncf %223 : vector<128x128xf32> to vector<128x128xbf16>
    %cst_119 = arith.constant dense<0.000000e+00> : vector<3x128xf32>
    %226 = tpu.matmul %224, %225, %cst_119 {dimension_numbers = #tpu.dot_dimension_numbers<[1], [0], [0], [1], [0, 0, 1, 1], [], []>} : vector<3x128xbf16>, vector<128x128xbf16>, vector<3x128xf32> -> vector<3x128xf32>
    %c0_120 = arith.constant 0 : index
    %c0_121 = arith.constant 0 : index
    %c0_122 = arith.constant 0 : index
    %227 = vector.load %arg10[%c0_120, %c0_121, %c0_122] : memref<3x1x128xf32, #tpu.memory_space<vmem>>, vector<1x1x128xf32>
    %228 = vector.shape_cast %227 : vector<1x1x128xf32> to vector<1x128xf32>
    %229 = vector.broadcast %228 : vector<1x128xf32> to vector<3x128xf32>
    %230 = arith.addf %226, %229 : vector<3x128xf32>
    %cst_123 = arith.constant 0.000000e+00 : f32
    %231 = vector.broadcast %cst_123 : f32 to vector<3x128xf32>
    %232 = arith.maximumf %230, %231 : vector<3x128xf32>
    %c1_124 = arith.constant 1 : index
    %c0_125 = arith.constant 0 : index
    %c0_126 = arith.constant 0 : index
    %233 = vector.load %arg9[%c1_124, %c0_125, %c0_126] : memref<3x128x128xf32, #tpu.memory_space<vmem>>, vector<1x128x128xf32>
    %234 = vector.shape_cast %233 : vector<1x128x128xf32> to vector<128x128xf32>
    %235 = arith.truncf %232 : vector<3x128xf32> to vector<3x128xbf16>
    %236 = arith.truncf %234 : vector<128x128xf32> to vector<128x128xbf16>
    %cst_127 = arith.constant dense<0.000000e+00> : vector<3x128xf32>
    %237 = tpu.matmul %235, %236, %cst_127 {dimension_numbers = #tpu.dot_dimension_numbers<[1], [0], [0], [1], [0, 0, 1, 1], [], []>} : vector<3x128xbf16>, vector<128x128xbf16>, vector<3x128xf32> -> vector<3x128xf32>
    %c1_128 = arith.constant 1 : index
    %c0_129 = arith.constant 0 : index
    %c0_130 = arith.constant 0 : index
    %238 = vector.load %arg10[%c1_128, %c0_129, %c0_130] : memref<3x1x128xf32, #tpu.memory_space<vmem>>, vector<1x1x128xf32>
    %239 = vector.shape_cast %238 : vector<1x1x128xf32> to vector<1x128xf32>
    %240 = vector.broadcast %239 : vector<1x128xf32> to vector<3x128xf32>
    %241 = arith.addf %237, %240 : vector<3x128xf32>
    %cst_131 = arith.constant 0.000000e+00 : f32
    %242 = vector.broadcast %cst_131 : f32 to vector<3x128xf32>
    %243 = arith.maximumf %241, %242 : vector<3x128xf32>
    %c2_132 = arith.constant 2 : index
    %c0_133 = arith.constant 0 : index
    %c0_134 = arith.constant 0 : index
    %244 = vector.load %arg9[%c2_132, %c0_133, %c0_134] : memref<3x128x128xf32, #tpu.memory_space<vmem>>, vector<1x128x128xf32>
    %245 = vector.shape_cast %244 : vector<1x128x128xf32> to vector<128x128xf32>
    %246 = arith.truncf %243 : vector<3x128xf32> to vector<3x128xbf16>
    %247 = arith.truncf %245 : vector<128x128xf32> to vector<128x128xbf16>
    %cst_135 = arith.constant dense<0.000000e+00> : vector<3x128xf32>
    %248 = tpu.matmul %246, %247, %cst_135 {dimension_numbers = #tpu.dot_dimension_numbers<[1], [0], [0], [1], [0, 0, 1, 1], [], []>} : vector<3x128xbf16>, vector<128x128xbf16>, vector<3x128xf32> -> vector<3x128xf32>
    %c2_136 = arith.constant 2 : index
    %c0_137 = arith.constant 0 : index
    %c0_138 = arith.constant 0 : index
    %249 = vector.load %arg10[%c2_136, %c0_137, %c0_138] : memref<3x1x128xf32, #tpu.memory_space<vmem>>, vector<1x1x128xf32>
    %250 = vector.shape_cast %249 : vector<1x1x128xf32> to vector<1x128xf32>
    %251 = vector.broadcast %250 : vector<1x128xf32> to vector<3x128xf32>
    %252 = arith.addf %248, %251 : vector<3x128xf32>
    %cst_139 = arith.constant 0.000000e+00 : f32
    %253 = vector.broadcast %cst_139 : f32 to vector<3x128xf32>
    %254 = arith.maximumf %252, %253 : vector<3x128xf32>
    %c0_140 = arith.constant 0 : index
    %c0_141 = arith.constant 0 : index
    %255 = vector.load %arg11[%c0_140, %c0_141] : memref<128x1xf32, #tpu.memory_space<vmem>>, vector<128x1xf32>
    %256 = arith.truncf %254 : vector<3x128xf32> to vector<3x128xbf16>
    %257 = arith.truncf %255 : vector<128x1xf32> to vector<128x1xbf16>
    %cst_142 = arith.constant dense<0.000000e+00> : vector<3x1xf32>
    %258 = tpu.matmul %256, %257, %cst_142 {dimension_numbers = #tpu.dot_dimension_numbers<[1], [0], [0], [1], [0, 0, 1, 1], [], []>} : vector<3x128xbf16>, vector<128x1xbf16>, vector<3x1xf32> -> vector<3x1xf32>
    %c0_143 = arith.constant 0 : index
    %c0_144 = arith.constant 0 : index
    %259 = vector.load %arg12[%c0_143, %c0_144] : memref<1x1xf32, #tpu.memory_space<vmem>>, vector<1x1xf32>
    %260 = vector.broadcast %259 : vector<1x1xf32> to vector<3x1xf32>
    %261 = arith.addf %258, %260 : vector<3x1xf32>
    %c0_145 = arith.constant 0 : index
    %c0_146 = arith.constant 0 : index
    %262 = vector.load %arg13[%c0_145, %c0_146] : memref<3x1xf32, #tpu.memory_space<vmem>>, vector<3x1xf32>
    tpu.vector_store %arg13[%c0_145, %c0_146], %261 {strides = array<i32>} : memref<3x1xf32, #tpu.memory_space<vmem>>, vector<3x1xf32>,
    return
  }
}

</mosaic_0001>

<bundles_post_ra>
// kernel: forward.1
= control target key start
LH: loop header
LB: loop body
LE: loop exit
PB: predicated region body
PF: predicated region fallthrough
CT: control target
= control target key end

     0   :  { %s1772_s0 = inlined_call_operand.vmem [shape: f32[16,128], index: 0, kind: input, shape index: {}]   ;;  %s1773_s1 = inlined_call_operand.vmem [shape: f32[16,16], index: 1, kind: input, shape index: {}]   ;;  %s1774_s2 = inlined_call_operand.vmem [shape: f32[6,1,16], index: 2, kind: input, shape index: {}]   ;;  %s1775_s3 = inlined_call_operand.hbm [shape: f32[6,128,128], index: 3, kind: input, shape index: {}]   ;;  %s1776_s4 = inlined_call_operand.vmem [shape: f32[6,1,128], index: 4, kind: input, shape index: {}]   ;;  %s1777_s5 = inlined_call_operand.hbm [shape: f32[3,128,128], index: 5, kind: input, shape index: {}]   ;;  %s1778_s6 = inlined_call_operand.vmem [shape: f32[3,1,128], index: 6, kind: input, shape index: {}]   ;;  %s1779_s7 = inlined_call_operand.vmem [shape: f32[3,16], index: 7, kind: input, shape index: {}]   ;;  %s1780_s8 = inlined_call_operand.vmem [shape: f32[3,128], index: 8, kind: input, shape index: {}]   ;;  %s1781_s9 = inlined_call_operand.hbm [shape: f32[3,128,128], index: 9, kind: input, shape index: {}]   ;;  %s1782_s10 = inlined_call_operand.vmem [shape: f32[3,1,128], index: 10, kind: input, shape index: {}]   ;;  %s1783_s11 = inlined_call_operand.vmem [shape: f32[128,1], index: 11, kind: input, shape index: {}]   ;;  %s1784_s12 = inlined_call_operand.<no memory space> [shape: f32[1,1], index: 12, kind: input, shape index: {}]   ;;  %s1785_s13 = inlined_call_operand.vmem [shape: f32[3,1], index: 13, kind: output, shape index: {}]  }
   0x1   :  { %v18_v0 = vstv %s1784_s12 }
   0x2   :  { %19 = vst [vmem:[#allocation2] sm:$0x1] %v18_v0 }
   0x3   :  { %20 = vsyncpa [#allocation4], 0 }
   0x4   :  { %21 = vsyncpa [#allocation6], 0  ;;  %s47_s29 = sshll.u32 %s1777_s5, 4  ;;  %s1479_s30 = smov [#allocation5]   ;;  %s48_s29 = int_to_ptr.hbm [resolvable:$true] %s47_s29 }
   0x5   :  { %s49_s14 = sshll.u32 %s1479_s30, 4  ;;  %s32_s17 = sshll.u32 %s1775_s3, 4  ;;  %s50_s14 = int_to_ptr.vmem [resolvable:$true] %s49_s14  ;;  %s33_s17 = int_to_ptr.hbm [resolvable:$true] %s32_s17 }
   0x6   :  { %s1480_s18 = smov 128   ;;  %s1481_s19 = smov 8  }
   0x7   :  { %55 = dma.hbm_to_vmem [thread:$0]  %s48_s29, 6144, %s50_s14, [#allocation6], %s1480_s18, %s1480_s18, %s1481_s19  }
   0x8   :  { %s1482_s12 = smov [#allocation3]   ;;  %s66_s23 = sshll.u32 %s1781_s9, 4  ;;  %s67_s23 = int_to_ptr.hbm [resolvable:$true] %s66_s23 }
   0x9   :  { %s34_s20 = sshll.u32 %s1482_s12, 4  ;;  %s1483_s5 = smov [#allocation7]   ;;  %s35_s20 = int_to_ptr.vmem [resolvable:$true] %s34_s20 }
   0xa   :  { %40 = dma.hbm_to_vmem [thread:$0]  %s33_s17, 12288, %s35_s20, [#allocation4], %s1480_s18, %s1480_s18, %s1481_s19  }
   0xb   :  { %s68_s24 = sshll.u32 %s1483_s5, 4  ;;  %s69_s24 = int_to_ptr.vmem [resolvable:$true] %s68_s24 }
   0xc   :  { %74 = dma.hbm_to_vmem [thread:$0]  %s67_s23, 6144, %s69_s24, [#allocation6], %s1480_s18, %s1480_s18, %s1481_s19  }
   0xd   :  { %1475 = dma.done.wait [#allocation4], 12288  }
   0xe   :  { %1476 = vsyncadd [#allocation4], 4294955008 }
   0xf   :  { %1477 = dma.done.wait [#allocation6], 12288  }
  0x10   :  { %1478 = vsyncadd [#allocation6], 4294955008  ;;  %v125_v1 = vld [vmem:[#allocation3 + $0x70] sm:$0xff]  ;;  %v126_v2 = vld [vmem:[#allocation3 + $0x78] sm:$0xff]  ;;  %vm158_vm0 = vcmask 130048  }
  0x11   :  { %v123_v3 = vld [vmem:[#allocation3 + $0x60] sm:$0xff]  ;;  %v135_v4 = vpack.c.bf16 %v126_v2, %v125_v1  ;;  %v124_v5 = vld [vmem:[#allocation3 + $0x68] sm:$0xff]  ;;  %v121_v7 = vld [vmem:[#allocation3 + $0x50] sm:$0xff] }
  0x12   :  { %v134_v6 = vpack.c.bf16 %v124_v5, %v123_v3  ;;  %v122_v8 = vld [vmem:[#allocation3 + $0x58] sm:$0xff]  ;;  %v119_v9 = vld [vmem:[#allocation3 + $0x40] sm:$0xff]  ;;  %v120_v10 = vld [vmem:[#allocation3 + $0x48] sm:$0xff] }
  0x13   :  { %140 = vmatpush.bf16.msra.mxu0 %v135_v4  ;;  %v133_v11 = vpack.c.bf16 %v122_v8, %v121_v7  ;;  %v132_v12 = vpack.c.bf16 %v120_v10, %v119_v9  ;;  %v117_v13 = vld [vmem:[#allocation3 + $0x30] sm:$0xff]  ;;  %v118_v14 = vld [vmem:[#allocation3 + $0x38] sm:$0xff]  ;;  %v115_v16 = vld [vmem:[#allocation3 + $0x20] sm:$0xff] }
  0x14   :  { %v131_v15 = vpack.c.bf16 %v118_v14, %v117_v13  ;;  %v116_v17 = vld [vmem:[#allocation3 + $0x28] sm:$0xff]  ;;  %v113_v19 = vld [vmem:[#allocation3 + $0x10] sm:$0xff]  ;;  %v114_v20 = vld [vmem:[#allocation3 + $0x18] sm:$0xff] }
  0x15   :  { %v130_v18 = vpack.c.bf16 %v116_v17, %v115_v16  ;;  %v129_v21 = vpack.c.bf16 %v114_v20, %v113_v19  ;;  %v111_v22 = vld [vmem:[#allocation3] sm:$0xff]  ;;  %v112_v23 = vld [vmem:[#allocation3 + $0x8] sm:$0xff]  ;;  %v100_v28 = vld [vmem:[%s1774_s2] sm:$0x1] }
  0x16   :  { %v128_v24 = vpack.c.bf16 %v112_v23, %v111_v22  ;;  %v94_v25 = vld [vmem:[%s1772_s0] sm:$0xff]  ;;  %v95_v26 = vld [vmem:[%s1772_s0 + $0x8] sm:$0xff]  ;;  %v101_v29 = vsub.f32 0.0, %v100_v28  ;;  %v267_v56 = vld [vmem:[#allocation3 + $0xf0] sm:$0xff] }
  0x17   :  { %141 = vmatpush.bf16.msra.mxu0 %v134_v6  ;;  %v127_v27 = vpack.c.bf16 %v95_v26, %v94_v25  ;;  %v96_v30 = vld [vmem:[%s1773_s1] sm:$0xff]  ;;  %v97_v31 = vld [vmem:[%s1773_s1 + $0x8] sm:$0xff]  ;;  %v263_v62 = vld [vmem:[#allocation3 + $0xd0] sm:$0xff] }
  0x18   :  { %v1581_v32 = vmul.f32 %v96_v30, %v96_v30  ;;  %v103_v33 = vperm.slane %v101_v29, 0  ;;  %v1583_v34 = vmul.f32 %v97_v31, %v97_v31  ;;  %v1318_v40 = vld [vmem:[%s1776_s4] ss:$0 sm:$0xff]  ;;  %v265_v59 = vld [vmem:[#allocation3 + $0xe0] sm:$0xff]  ;;  %v266_v60 = vld [vmem:[#allocation3 + $0xe8] sm:$0xff] }
  0x19   :  { %v268_v57 = vld [vmem:[#allocation3 + $0xf8] sm:$0xff]  ;;  %v276_v61 = vpack.c.bf16 %v266_v60, %v265_v59  ;;  %v261_v1 = vld [vmem:[#allocation3 + $0xc0] sm:$0xff]  ;;  %v262_v2 = vld [vmem:[#allocation3 + $0xc8] sm:$0xff] }
  0x1a   :  { %v105_v35 = vmul.f32 %v103_v33, %v1581_v32  ;;  %v106_v36 = vmul.f32 %v103_v33, %v1583_v34  ;;  %v277_v58 = vpack.c.bf16 %v268_v57, %v267_v56  ;;  %v264_v63 = vld [vmem:[#allocation3 + $0xd8] sm:$0xff]  ;;  %v274_v4 = vpack.c.bf16 %v262_v2, %v261_v1  ;;  %v259_v5 = vld [vmem:[#allocation3 + $0xb0] sm:$0xff]  ;;  %v257_v8 = vld [vmem:[#allocation3 + $0xa0] sm:$0xff] }
  0x1b   :  { %142 = vmatpush.bf16.msra.mxu0 %v133_v11  ;;  %v275_v0 = vpack.c.bf16 %v264_v63, %v263_v62  ;;  %v260_v6 = vld [vmem:[#allocation3 + $0xb8] sm:$0xff]  ;;  %v258_v9 = vld [vmem:[#allocation3 + $0xa8] sm:$0xff] }
  0x1c   :  { %v107_v38 = vmul.f32 1.442695, %v105_v35  ;;  %v109_v39 = vmul.f32 1.442695, %v106_v36  ;;  %283 = vmatpush.bf16.msra.mxu2 %v277_v58  ;;  %v273_v7 = vpack.c.bf16 %v260_v6, %v259_v5  ;;  %v272_v10 = vpack.c.bf16 %v258_v9, %v257_v8  ;;  %v256_v13 = vld [vmem:[#allocation3 + $0x98] sm:$0xff]  ;;  %v254_v19 = vld [vmem:[#allocation3 + $0x88] sm:$0xff] }
  0x1e   :  { %1331 = vpow2.f32 %v107_v38 }
  0x1f   :  { %143 = vmatpush.bf16.msra.mxu0 %v132_v12  ;;  %1333 = vpow2.f32 %v109_v39  ;;  %v255_v12 = vld [vmem:[#allocation3 + $0x90] sm:$0xff] }
  0x20   :  { %284 = vmatpush.bf16.msra.mxu2 %v276_v61  ;;  %v271_v17 = vpack.c.bf16 %v256_v13, %v255_v12 }
  0x23   :  { %144 = vmatpush.bf16.msra.mxu0 %v131_v15 }
  0x24   :  { %v1332_v44 = vpop.eup %1331  ;;  %285 = vmatpush.bf16.msra.mxu2 %v275_v0 }
  0x25   :  { %v1334_v45 = vpop.eup %1333 }
  0x26   :  { %v156_v49 = vpack.c.bf16 %v1334_v45, %v1332_v44 }
  0x27   :  { %145 = vmatpush.bf16.msra.mxu0 %v130_v18  ;;  %v253_v18 = vld [vmem:[#allocation3 + $0x80] sm:$0xff] }
  0x28   :  { %286 = vmatpush.bf16.msra.mxu2 %v274_v4  ;;  %v270_v22 = vpack.c.bf16 %v254_v19, %v253_v18 }
  0x2b   :  { %146 = vmatpush.bf16.msra.mxu0 %v129_v21 }
  0x2c   :  { %287 = vmatpush.bf16.msra.mxu2 %v273_v7 }
  0x2f   :  { %147 = vmatpush.bf16.msra.mxu0 %v128_v24 }
  0x30   :  { %288 = vmatpush.bf16.msra.mxu2 %v272_v10 }
  0x32   :  { %148 = vmatmul.bf16.vlgmr.msra.gmra.mxu0 %v127_v27 }
  0x34   :  { %289 = vmatpush.bf16.msra.mxu2 %v271_v17 }
  0x38   :  { %290 = vmatpush.bf16.msra.mxu2 %v270_v22 }
  0xaf   :  { %v149_v37 = vpop.f32.mrf.mxu0 }
  0xb0   :  { %v150_v41 = vadd.f32 %v1318_v40, %v149_v37 }
  0xb2   :  { %v154_v46 = vmax.f32 %v150_v41, 0.0 }
  0xb7   :  { %v151_v42 = vpop.f32.mrf.mxu0 }
  0xb8   :  { %v152_v43 = vadd.f32 %v1318_v40, %v151_v42 }
  0xba   :  { %v155_v47 = vmax.f32 %v152_v43, 0.0 }
  0xbc   :  { %v157_v48 = vpack.c.bf16 %v155_v47, %v154_v46 }
  0xbe   :  { %169 = vmatpush.bf16.msra.mxu1 %v157_v48 }
  0xc1   :  { %1292 = vmatmul.msk.bf16.vlgmr.msra.gmra.mxu1 %vm158_vm0, %v156_v49 }
 0x13e   :  { %v171_v50 = vpop.f32.mrf.mxu1 }
 0x13f   :  { %v1591_v51 = vadd.f32 %v171_v50, %v154_v46 }
 0x141   :  { %v178_v52 = vmul.f32 %v1591_v51, %v1591_v51 }
 0x143   :  { %180 = vadd.xlane.f32.xlu0 %v178_v52 }
 0x146   :  { %v173_v53 = vpop.f32.mrf.mxu1 }
 0x147   :  { %v1595_v54 = vadd.f32 %v173_v53, %v155_v47 }
 0x149   :  { %v179_v55 = vmul.f32 %v1595_v54, %v1595_v54 }
 0x14b   :  { %182 = vadd.xlane.f32.xlu0 %v179_v55 }
 0x1b6   :  { %v181_v3 = vpop.xlane.xlu0 %180 }
 0x1b7   :  { %1335 = vrsqrt.f32 %v181_v3  ;;  %vm191_vm1 = vcmp.eq.f32.partialorder %v181_v3, inf  ;;  %v194_v28 = vand.u32 2147483648, %v181_v3  ;;  %vm193_vm2 = vcmp.eq.f32.partialorder %v181_v3, 0.0 }
 0x1bd   :  { %v1336_v11 = vpop.eup %1335 }
 0x1be   :  { %v185_v14 = vmul.f32 %v1336_v11, %v181_v3  ;;  %v183_v15 = vpop.xlane.xlu0 %182 }
 0x1bf   :  { %1337 = vrsqrt.f32 %v183_v15  ;;  %vm203_vm3 = vcmp.eq.f32.partialorder %v183_v15, inf  ;;  %v206_v38 = vand.u32 2147483648, %v183_v15  ;;  %vm205_vm4 = vcmp.eq.f32.partialorder %v183_v15, 0.0 }
 0x1c0   :  { %v186_v16 = vmul.f32 %v1336_v11, %v185_v14 }
 0x1c2   :  { %v187_v20 = vmul.f32 0.5, %v186_v16 }
 0x1c4   :  { %v188_v21 = vsub.f32 1.5, %v187_v20 }
 0x1c5   :  { %v1338_v23 = vpop.eup %1337 }
 0x1c6   :  { %v189_v24 = vmul.f32 %v1336_v11, %v188_v21  ;;  %v197_v25 = vmul.f32 %v1338_v23, %v183_v15 }
 0x1c8   :  { %v190_v26 = vmul.f32 %v189_v24, %v181_v3  ;;  %v198_v27 = vmul.f32 %v1338_v23, %v197_v25  ;;  %v409_v25 = vld [vmem:[#allocation3 + $0x170] sm:$0xff] }
 0x1ca   :  { %v192_v29 = vsel %vm191_vm1, %v181_v3, %v190_v26  ;;  %v199_v30 = vmul.f32 0.5, %v198_v27  ;;  %v1293_v3 = vld [vmem:[%s1774_s2 + $0x1] sm:$0x1]  ;;  %v410_v26 = vld [vmem:[#allocation3 + $0x178] sm:$0xff] }
 0x1cb   :  { %v195_v31 = vsel %vm193_vm2, %v194_v28, %v192_v29  ;;  %v242_v4 = vsub.f32 0.0, %v1293_v3  ;;  %v419_v27 = vpack.c.bf16 %v410_v26, %v409_v25  ;;  %v407_v28 = vld [vmem:[#allocation3 + $0x160] sm:$0xff]  ;;  %v408_v29 = vld [vmem:[#allocation3 + $0x168] sm:$0xff] }
 0x1cc   :  { %v208_v33 = vmax.f32 %v195_v31, 1e-12  ;;  %v200_v35 = vsub.f32 1.5, %v199_v30  ;;  %v418_v30 = vpack.c.bf16 %v408_v29, %v407_v28  ;;  %v405_v31 = vld [vmem:[#allocation3 + $0x150] sm:$0xff] }
 0x1cd   :  { %v244_v5 = vperm.slane %v242_v4, 0  ;;  %425 = vmatpush.bf16.msrb.mxu1 %v419_v27 }
 0x1ce   :  { %1339 = vrcp.f32 %v208_v33  ;;  %v201_v36 = vmul.f32 %v1338_v23, %v200_v35  ;;  %v221_v49 = vand.u32 2147483648, %v208_v33  ;;  %vm215_vm6 = vweird.f32 %v208_v33 }
 0x1cf   :  { %v219_v50 = vand.u32 2147483647, %v208_v33  ;;  %v246_v6 = vmul.f32 %v244_v5, %v1581_v32  ;;  %v247_v7 = vmul.f32 %v244_v5, %v1583_v34 }
 0x1d0   :  { %v202_v37 = vmul.f32 %v201_v36, %v183_v15  ;;  %v222_v58 = vor.u32 1.1754944e-38, %v221_v49  ;;  %v397_v49 = vld [vmem:[#allocation3 + $0x110] sm:$0xff] }
 0x1d1   :  { %vm220_vm9 = vcmp.eq.f32.partialorder %v219_v50, 8.507059e+37  ;;  %v248_v9 = vmul.f32 1.442695, %v246_v6  ;;  %v250_v10 = vmul.f32 1.442695, %v247_v7  ;;  %426 = vmatpush.bf16.msrb.mxu1 %v418_v30  ;;  %v398_v50 = vld [vmem:[#allocation3 + $0x118] sm:$0xff] }
 0x1d2   :  { %v204_v39 = vsel %vm203_vm3, %v183_v15, %v202_v37  ;;  %v403_v37 = vld [vmem:[#allocation3 + $0x140] sm:$0xff] }
 0x1d3   :  { %v207_v40 = vsel %vm205_vm4, %v206_v38, %v204_v39  ;;  %v404_v38 = vld [vmem:[#allocation3 + $0x148] sm:$0xff]  ;;  %v401_v39 = vld [vmem:[#allocation3 + $0x130] sm:$0xff] }
 0x1d4   :  { %v1340_v41 = vpop.eup %1339  ;;  %v209_v42 = vmax.f32 %v207_v40, 1e-12  ;;  %v402_v40 = vld [vmem:[#allocation3 + $0x138] sm:$0xff] }
 0x1d5   :  { %v211_v43 = vmul.f32 %v1340_v41, %v208_v33  ;;  %vm216_vm5 = vweird.f32 %v1340_v41  ;;  %v406_v33 = vld [vmem:[#allocation3 + $0x158] sm:$0xff] }
 0x1d6   :  { %1341 = vrcp.f32 %v209_v42  ;;  %vm217_vm7 = vmor %vm215_vm6, %vm216_vm5  ;;  %v236_v53 = vand.u32 2147483648, %v209_v42  ;;  %v234_v57 = vand.u32 2147483647, %v209_v42  ;;  %vm230_vm10 = vweird.f32 %v209_v42 }
 0x1d7   :  { %v212_v44 = vsub.f32 1.0, %v211_v43  ;;  %1343 = vpow2.f32 %v248_v9  ;;  %v417_v35 = vpack.c.bf16 %v406_v33, %v405_v31  ;;  %v399_v43 = vld [vmem:[#allocation3 + $0x120] sm:$0xff] }
 0x1d8   :  { %v237_v61 = vor.u32 1.1754944e-38, %v236_v53  ;;  %vm235_vm12 = vcmp.eq.f32.partialorder %v234_v57, 8.507059e+37  ;;  %1345 = vpow2.f32 %v250_v10  ;;  %v396_v57 = vld [vmem:[#allocation3 + $0x108] sm:$0xff] }
 0x1d9   :  { %v213_v45 = vmul.f32 %v1340_v41, %v212_v44  ;;  %427 = vmatpush.bf16.msrb.mxu1 %v417_v35  ;;  %v400_v44 = vld [vmem:[#allocation3 + $0x128] sm:$0xff] }
 0x1db   :  { %v214_v47 = vadd.f32 %v1340_v41, %v213_v45 }
 0x1dc   :  { %v1342_v46 = vpop.eup %1341 }
 0x1dd   :  { %v226_v48 = vmul.f32 %v1342_v46, %v209_v42  ;;  %v218_v55 = vsel %vm217_vm7, %v1340_v41, %v214_v47  ;;  %vm231_vm8 = vweird.f32 %v1342_v46  ;;  %v1344_v13 = vpop.eup %1343  ;;  %v416_v41 = vpack.c.bf16 %v404_v38, %v403_v37  ;;  %v1296_v38 = vld [vmem:[%s1774_s2 + $0x2] sm:$0x1] }
 0x1de   :  { %v223_v60 = vsel %vm220_vm9, %v222_v58, %v218_v55  ;;  %vm232_vm11 = vmor %vm230_vm10, %vm231_vm8  ;;  %v1346_v14 = vpop.eup %1345  ;;  %v415_v42 = vpack.c.bf16 %v402_v40, %v401_v39  ;;  %v413_v55 = vpack.c.bf16 %v398_v50, %v397_v49  ;;  %v384_v39 = vsub.f32 0.0, %v1296_v38 }
 0x1df   :  { %v227_v52 = vsub.f32 1.0, %v226_v48  ;;  %v224_v0 = vmul.f32 %v223_v60, %v1591_v51  ;;  %v1319_v51 = vld [vmem:[%s1776_s4 + $0x1] ss:$0 sm:$0xff]  ;;  %v299_v18 = vpack.c.bf16 %v1346_v14, %v1344_v13  ;;  %428 = vmatpush.bf16.msrb.mxu1 %v416_v41  ;;  %v414_v48 = vpack.c.bf16 %v400_v44, %v399_v43 }
 0x1e0   :  { %v386_v40 = vperm.slane %v384_v39, 0 }
 0x1e1   :  { %v228_v56 = vmul.f32 %v1342_v46, %v227_v52 }
 0x1e2   :  { %v388_v41 = vmul.f32 %v386_v40, %v1581_v32 }
 0x1e3   :  { %v229_v59 = vadd.f32 %v1342_v46, %v228_v56  ;;  %429 = vmatpush.bf16.msrb.mxu1 %v415_v42  ;;  %v395_v56 = vld [vmem:[#allocation3 + $0x100] sm:$0xff]  ;;  %v389_v42 = vmul.f32 %v386_v40, %v1583_v34 }
 0x1e4   :  { %v390_v44 = vmul.f32 1.442695, %v388_v41 }
 0x1e5   :  { %v233_v62 = vsel %vm232_vm11, %v1342_v46, %v229_v59 }
 0x1e6   :  { %v238_v63 = vsel %vm235_vm12, %v237_v61, %v233_v62  ;;  %v412_v62 = vpack.c.bf16 %v396_v57, %v395_v56 }
 0x1e7   :  { %v239_v1 = vmul.f32 %v238_v63, %v1595_v54  ;;  %430 = vmatpush.bf16.msrb.mxu1 %v414_v48 }
 0x1e9   :  { %v269_v2 = vpack.c.bf16 %v239_v1, %v224_v0 }
 0x1eb   :  { %291 = vmatmul.bf16.vlgmr.msra.gmra.mxu2 %v269_v2  ;;  %431 = vmatpush.bf16.msrb.mxu1 %v413_v55 }
 0x1ef   :  { %432 = vmatpush.bf16.msrb.mxu1 %v412_v62  ;;  %v551_v62 = vld [vmem:[#allocation3 + $0x1f0] sm:$0xff] }
 0x26e   :  { %v292_v8 = vpop.f32.mrf.mxu2 }
 0x26f   :  { %v293_v54 = vadd.f32 %v1319_v51, %v292_v8 }
 0x271   :  { %v297_v15 = vmax.f32 %v293_v54, 0.0 }
 0x276   :  { %v294_v11 = vpop.f32.mrf.mxu2 }
 0x277   :  { %v295_v12 = vadd.f32 %v1319_v51, %v294_v11 }
 0x279   :  { %v298_v16 = vmax.f32 %v295_v12, 0.0 }
 0x27b   :  { %v300_v17 = vpack.c.bf16 %v298_v16, %v297_v15 }
 0x27d   :  { %311 = vmatpush.bf16.msra.mxu3 %v300_v17 }
 0x280   :  { %1295 = vmatmul.msk.bf16.vlgmr.msra.gmra.mxu3 %vm158_vm0, %v299_v18 }
 0x303   :  { %v313_v19 = vpop.f32.mrf.mxu3 }
 0x304   :  { %v1610_v20 = vadd.f32 %v313_v19, %v297_v15 }
 0x306   :  { %v320_v21 = vmul.f32 %v1610_v20, %v1610_v20 }
 0x308   :  { %322 = vadd.xlane.f32.xlu1 %v320_v21 }
 0x30b   :  { %v315_v22 = vpop.f32.mrf.mxu3 }
 0x30c   :  { %v1614_v23 = vadd.f32 %v315_v22, %v298_v16 }
 0x30e   :  { %v321_v24 = vmul.f32 %v1614_v23, %v1614_v23 }
 0x310   :  { %324 = vadd.xlane.f32.xlu1 %v321_v24 }
 0x37b   :  { %v323_v36 = vpop.xlane.xlu1 %322 }
 0x37c   :  { %1347 = vrsqrt.f32 %v323_v36  ;;  %vm333_vm13 = vcmp.eq.f32.partialorder %v323_v36, inf  ;;  %v336_v1 = vand.u32 2147483648, %v323_v36  ;;  %vm335_vm14 = vcmp.eq.f32.partialorder %v323_v36, 0.0 }
 0x382   :  { %v1348_v45 = vpop.eup %1347 }
 0x383   :  { %v327_v46 = vmul.f32 %v1348_v45, %v323_v36  ;;  %v325_v47 = vpop.xlane.xlu1 %324 }
 0x384   :  { %1349 = vrsqrt.f32 %v325_v47  ;;  %vm345_vm15 = vcmp.eq.f32.partialorder %v325_v47, inf  ;;  %v348_v9 = vand.u32 2147483648, %v325_v47  ;;  %vm347_vm1 = vcmp.eq.f32.partialorder %v325_v47, 0.0 }
 0x385   :  { %v328_v52 = vmul.f32 %v1348_v45, %v327_v46 }
 0x387   :  { %v329_v53 = vmul.f32 0.5, %v328_v52 }
 0x389   :  { %v330_v58 = vsub.f32 1.5, %v329_v53 }
 0x38a   :  { %v1350_v59 = vpop.eup %1349 }
 0x38b   :  { %v331_v60 = vmul.f32 %v1348_v45, %v330_v58  ;;  %v339_v61 = vmul.f32 %v1350_v59, %v325_v47  ;;  %v392_v45 = vmul.f32 1.442695, %v389_v42 }
 0x38d   :  { %v332_v63 = vmul.f32 %v331_v60, %v323_v36  ;;  %v340_v0 = vmul.f32 %v1350_v59, %v339_v61 }
 0x38f   :  { %v334_v2 = vsel %vm333_vm13, %v323_v36, %v332_v63  ;;  %v341_v3 = vmul.f32 0.5, %v340_v0  ;;  %v552_v63 = vld [vmem:[#allocation3 + $0x1f8] sm:$0xff] }
 0x390   :  { %v337_v4 = vsel %vm335_vm14, %v336_v1, %v334_v2  ;;  %v561_v0 = vpack.c.bf16 %v552_v63, %v551_v62  ;;  %v549_v1 = vld [vmem:[#allocation3 + $0x1e0] sm:$0xff]  ;;  %v550_v2 = vld [vmem:[#allocation3 + $0x1e8] sm:$0xff] }
 0x391   :  { %v350_v5 = vmax.f32 %v337_v4, 1e-12  ;;  %v342_v6 = vsub.f32 1.5, %v341_v3  ;;  %v560_v3 = vpack.c.bf16 %v550_v2, %v549_v1  ;;  %v547_v4 = vld [vmem:[#allocation3 + $0x1d0] sm:$0xff] }
 0x393   :  { %1351 = vrcp.f32 %v350_v5  ;;  %v343_v7 = vmul.f32 %v1350_v59, %v342_v6  ;;  %v363_v18 = vand.u32 2147483648, %v350_v5  ;;  %vm357_vm3 = vweird.f32 %v350_v5 }
 0x394   :  { %v361_v19 = vand.u32 2147483647, %v350_v5 }
 0x395   :  { %v344_v8 = vmul.f32 %v343_v7, %v325_v47  ;;  %v364_v27 = vor.u32 1.1754944e-38, %v363_v18  ;;  %v539_v18 = vld [vmem:[#allocation3 + $0x190] sm:$0xff] }
 0x396   :  { %vm362_vm6 = vcmp.eq.f32.partialorder %v361_v19, 8.507059e+37  ;;  %v540_v19 = vld [vmem:[#allocation3 + $0x198] sm:$0xff] }
 0x397   :  { %v346_v10 = vsel %vm345_vm15, %v325_v47, %v344_v8  ;;  %v545_v8 = vld [vmem:[#allocation3 + $0x1c0] sm:$0xff] }
 0x398   :  { %v349_v51 = vsel %vm347_vm1, %v348_v9, %v346_v10  ;;  %v546_v9 = vld [vmem:[#allocation3 + $0x1c8] sm:$0xff]  ;;  %v543_v10 = vld [vmem:[#allocation3 + $0x1b0] sm:$0xff] }
 0x399   :  { %v1352_v54 = vpop.eup %1351  ;;  %v351_v11 = vmax.f32 %v349_v51, 1e-12  ;;  %v544_v51 = vld [vmem:[#allocation3 + $0x1b8] sm:$0xff] }
 0x39a   :  { %v353_v12 = vmul.f32 %v1352_v54, %v350_v5  ;;  %vm358_vm2 = vweird.f32 %v1352_v54  ;;  %v548_v5 = vld [vmem:[#allocation3 + $0x1d8] sm:$0xff] }
 0x39b   :  { %1353 = vrcp.f32 %v351_v11  ;;  %vm359_vm4 = vmor %vm357_vm3, %vm358_vm2  ;;  %v378_v22 = vand.u32 2147483648, %v351_v11  ;;  %v376_v26 = vand.u32 2147483647, %v351_v11  ;;  %vm372_vm7 = vweird.f32 %v351_v11 }
 0x39c   :  { %v354_v13 = vsub.f32 1.0, %v353_v12  ;;  %1355 = vpow2.f32 %v390_v44  ;;  %v559_v6 = vpack.c.bf16 %v548_v5, %v547_v4  ;;  %v541_v12 = vld [vmem:[#allocation3 + $0x1a0] sm:$0xff] }
 0x39d   :  { %v379_v30 = vor.u32 1.1754944e-38, %v378_v22  ;;  %vm377_vm9 = vcmp.eq.f32.partialorder %v376_v26, 8.507059e+37  ;;  %1357 = vpow2.f32 %v392_v45  ;;  %v538_v26 = vld [vmem:[#allocation3 + $0x188] sm:$0xff] }
 0x39e   :  { %v355_v14 = vmul.f32 %v1352_v54, %v354_v13  ;;  %v542_v13 = vld [vmem:[#allocation3 + $0x1a8] sm:$0xff] }
 0x3a0   :  { %v356_v16 = vadd.f32 %v1352_v54, %v355_v14 }
 0x3a1   :  { %v1354_v15 = vpop.eup %1353 }
 0x3a2   :  { %v368_v17 = vmul.f32 %v1354_v15, %v351_v11  ;;  %v360_v24 = vsel %vm359_vm4, %v1352_v54, %v356_v16  ;;  %vm373_vm5 = vweird.f32 %v1354_v15  ;;  %v1356_v48 = vpop.eup %1355  ;;  %v558_v54 = vpack.c.bf16 %v546_v9, %v545_v8  ;;  %v1299_v9 = vld [vmem:[%s1774_s2 + $0x3] sm:$0x1] }
 0x3a3   :  { %v365_v29 = vsel %vm362_vm6, %v364_v27, %v360_v24  ;;  %vm374_vm8 = vmor %vm372_vm7, %vm373_vm5  ;;  %v1358_v49 = vpop.eup %1357  ;;  %v557_v11 = vpack.c.bf16 %v544_v51, %v543_v10  ;;  %v555_v24 = vpack.c.bf16 %v540_v19, %v539_v18  ;;  %v526_v10 = vsub.f32 0.0, %v1299_v9 }
 0x3a4   :  { %v369_v21 = vsub.f32 1.0, %v368_v17  ;;  %v366_v35 = vmul.f32 %v365_v29, %v1610_v20  ;;  %v1320_v20 = vld [vmem:[%s1776_s4 + $0x2] ss:$0 sm:$0xff]  ;;  %v441_v55 = vpack.c.bf16 %v1358_v49, %v1356_v48  ;;  %v556_v17 = vpack.c.bf16 %v542_v13, %v541_v12 }
 0x3a5   :  { %v528_v51 = vperm.slane %v526_v10, 0 }
 0x3a6   :  { %v370_v25 = vmul.f32 %v1354_v15, %v369_v21 }
 0x3a8   :  { %v371_v28 = vadd.f32 %v1354_v15, %v370_v25  ;;  %v537_v25 = vld [vmem:[#allocation3 + $0x180] sm:$0xff] }
 0x3aa   :  { %v375_v31 = vsel %vm374_vm8, %v1354_v15, %v371_v28 }
 0x3ab   :  { %v380_v33 = vsel %vm377_vm9, %v379_v30, %v375_v31  ;;  %v554_v31 = vpack.c.bf16 %v538_v26, %v537_v25 }
 0x3ac   :  { %v381_v36 = vmul.f32 %v380_v33, %v1614_v23 }
 0x3ae   :  { %v411_v37 = vpack.c.bf16 %v381_v36, %v366_v35 }
 0x3b0   :  { %433 = vmatmul.bf16.vlgmr.msrb.gmra.mxu1 %v411_v37 }
 0x42d   :  { %v434_v43 = vpop.f32.mrf.mxu1 }
 0x42e   :  { %v435_v23 = vadd.f32 %v1320_v20, %v434_v43 }
 0x430   :  { %v439_v50 = vmax.f32 %v435_v23, 0.0 }
 0x435   :  { %v436_v46 = vpop.f32.mrf.mxu1 }
 0x436   :  { %v437_v47 = vadd.f32 %v1320_v20, %v436_v46 }
 0x438   :  { %v440_v52 = vmax.f32 %v437_v47, 0.0 }
 0x43a   :  { %v442_v53 = vpack.c.bf16 %v440_v52, %v439_v50 }
 0x43c   :  { %453 = vmatpush.bf16.msrb.mxu3 %v442_v53 }
 0x43f   :  { %1298 = vmatmul.msk.bf16.vlgmr.msrb.gmra.mxu3 %vm158_vm0, %v441_v55 }
 0x440   :  { %567 = vmatpush.bf16.msra.mxu3 %v561_v0 }
 0x444   :  { %568 = vmatpush.bf16.msra.mxu3 %v560_v3 }
 0x448   :  { %569 = vmatpush.bf16.msra.mxu3 %v559_v6 }
 0x44c   :  { %570 = vmatpush.bf16.msra.mxu3 %v558_v54  ;;  %v530_v54 = vmul.f32 %v528_v51, %v1581_v32 }
 0x44e   :  { %v532_v13 = vmul.f32 1.442695, %v530_v54 }
 0x450   :  { %571 = vmatpush.bf16.msra.mxu3 %v557_v11  ;;  %v531_v11 = vmul.f32 %v528_v51, %v1583_v34 }
 0x454   :  { %572 = vmatpush.bf16.msra.mxu3 %v556_v17 }
 0x458   :  { %573 = vmatpush.bf16.msra.mxu3 %v555_v24 }
 0x45c   :  { %574 = vmatpush.bf16.msra.mxu3 %v554_v31  ;;  %v693_v31 = vld [vmem:[#allocation3 + $0x270] sm:$0xff] }
 0x4c2   :  { %v455_v56 = vpop.f32.mrf.mxu3 }
 0x4c3   :  { %v1629_v57 = vadd.f32 %v455_v56, %v439_v50 }
 0x4c5   :  { %v462_v58 = vmul.f32 %v1629_v57, %v1629_v57 }
 0x4c7   :  { %464 = vadd.xlane.f32.xlu2 %v462_v58 }
 0x4ca   :  { %v457_v59 = vpop.f32.mrf.mxu3 }
 0x4cb   :  { %v1633_v60 = vadd.f32 %v457_v59, %v440_v52 }
 0x4cd   :  { %v463_v61 = vmul.f32 %v1633_v60, %v1633_v60 }
 0x4cf   :  { %466 = vadd.xlane.f32.xlu2 %v463_v61 }
 0x53a   :  { %v465_v7 = vpop.xlane.xlu2 %464 }
 0x53b   :  { %1359 = vrsqrt.f32 %v465_v7  ;;  %vm475_vm10 = vcmp.eq.f32.partialorder %v465_v7, inf  ;;  %v478_v36 = vand.u32 2147483648, %v465_v7  ;;  %vm477_vm11 = vcmp.eq.f32.partialorder %v465_v7, 0.0 }
 0x541   :  { %v1360_v14 = vpop.eup %1359 }
 0x542   :  { %v469_v15 = vmul.f32 %v1360_v14, %v465_v7  ;;  %v467_v16 = vpop.xlane.xlu2 %466 }
 0x543   :  { %1361 = vrsqrt.f32 %v467_v16  ;;  %vm487_vm12 = vcmp.eq.f32.partialorder %v467_v16, inf  ;;  %v490_v44 = vand.u32 2147483648, %v467_v16  ;;  %vm489_vm13 = vcmp.eq.f32.partialorder %v467_v16, 0.0 }
 0x544   :  { %v470_v21 = vmul.f32 %v1360_v14, %v469_v15 }
 0x546   :  { %v471_v22 = vmul.f32 0.5, %v470_v21 }
 0x548   :  { %v472_v27 = vsub.f32 1.5, %v471_v22 }
 0x549   :  { %v1362_v28 = vpop.eup %1361 }
 0x54a   :  { %v473_v29 = vmul.f32 %v1360_v14, %v472_v27  ;;  %v481_v30 = vmul.f32 %v1362_v28, %v467_v16  ;;  %v534_v14 = vmul.f32 1.442695, %v531_v11 }
 0x54c   :  { %v474_v33 = vmul.f32 %v473_v29, %v465_v7  ;;  %v482_v35 = vmul.f32 %v1362_v28, %v481_v30 }
 0x54e   :  { %v476_v37 = vsel %vm475_vm10, %v465_v7, %v474_v33  ;;  %v483_v38 = vmul.f32 0.5, %v482_v35  ;;  %v694_v33 = vld [vmem:[#allocation3 + $0x278] sm:$0xff] }
 0x54f   :  { %v479_v39 = vsel %vm477_vm11, %v478_v36, %v476_v37  ;;  %v703_v35 = vpack.c.bf16 %v694_v33, %v693_v31  ;;  %v691_v36 = vld [vmem:[#allocation3 + $0x260] sm:$0xff]  ;;  %v692_v37 = vld [vmem:[#allocation3 + $0x268] sm:$0xff] }
 0x550   :  { %v492_v40 = vmax.f32 %v479_v39, 1e-12  ;;  %v484_v41 = vsub.f32 1.5, %v483_v38  ;;  %v702_v38 = vpack.c.bf16 %v692_v37, %v691_v36  ;;  %v689_v39 = vld [vmem:[#allocation3 + $0x250] sm:$0xff] }
 0x551   :  { %709 = vmatpush.bf16.msrb.mxu2 %v703_v35 }
 0x552   :  { %1363 = vrcp.f32 %v492_v40  ;;  %v485_v42 = vmul.f32 %v1362_v28, %v484_v41  ;;  %v505_v55 = vand.u32 2147483648, %v492_v40  ;;  %vm499_vm15 = vweird.f32 %v492_v40 }
 0x553   :  { %v503_v56 = vand.u32 2147483647, %v492_v40 }
 0x554   :  { %v486_v43 = vmul.f32 %v485_v42, %v467_v16  ;;  %v506_v0 = vor.u32 1.1754944e-38, %v505_v55  ;;  %v681_v55 = vld [vmem:[#allocation3 + $0x210] sm:$0xff] }
 0x555   :  { %vm504_vm3 = vcmp.eq.f32.partialorder %v503_v56, 8.507059e+37  ;;  %710 = vmatpush.bf16.msrb.mxu2 %v702_v38  ;;  %v682_v56 = vld [vmem:[#allocation3 + $0x218] sm:$0xff] }
 0x556   :  { %v488_v45 = vsel %vm487_vm12, %v467_v16, %v486_v43  ;;  %v687_v43 = vld [vmem:[#allocation3 + $0x240] sm:$0xff] }
 0x557   :  { %v491_v20 = vsel %vm489_vm13, %v490_v44, %v488_v45  ;;  %v688_v44 = vld [vmem:[#allocation3 + $0x248] sm:$0xff]  ;;  %v685_v45 = vld [vmem:[#allocation3 + $0x230] sm:$0xff] }
 0x558   :  { %v1364_v23 = vpop.eup %1363  ;;  %v493_v46 = vmax.f32 %v491_v20, 1e-12  ;;  %v686_v20 = vld [vmem:[#allocation3 + $0x238] sm:$0xff] }
 0x559   :  { %v495_v47 = vmul.f32 %v1364_v23, %v492_v40  ;;  %vm500_vm14 = vweird.f32 %v1364_v23  ;;  %v690_v40 = vld [vmem:[#allocation3 + $0x258] sm:$0xff] }
 0x55a   :  { %1365 = vrcp.f32 %v493_v46  ;;  %vm501_vm1 = vmor %vm499_vm15, %vm500_vm14  ;;  %v520_v59 = vand.u32 2147483648, %v493_v46  ;;  %v518_v63 = vand.u32 2147483647, %v493_v46  ;;  %vm514_vm4 = vweird.f32 %v493_v46 }
 0x55b   :  { %v496_v48 = vsub.f32 1.0, %v495_v47  ;;  %1367 = vpow2.f32 %v532_v13  ;;  %v701_v41 = vpack.c.bf16 %v690_v40, %v689_v39  ;;  %v683_v47 = vld [vmem:[#allocation3 + $0x220] sm:$0xff] }
 0x55c   :  { %v521_v3 = vor.u32 1.1754944e-38, %v520_v59  ;;  %vm519_vm6 = vcmp.eq.f32.partialorder %v518_v63, 8.507059e+37  ;;  %1369 = vpow2.f32 %v534_v14  ;;  %v680_v63 = vld [vmem:[#allocation3 + $0x208] sm:$0xff] }
 0x55d   :  { %v497_v49 = vmul.f32 %v1364_v23, %v496_v48  ;;  %711 = vmatpush.bf16.msrb.mxu2 %v701_v41  ;;  %v684_v48 = vld [vmem:[#allocation3 + $0x228] sm:$0xff] }
 0x55f   :  { %v498_v52 = vadd.f32 %v1364_v23, %v497_v49 }
 0x560   :  { %v1366_v50 = vpop.eup %1365 }
 0x561   :  { %v510_v53 = vmul.f32 %v1366_v50, %v493_v46  ;;  %v502_v61 = vsel %vm501_vm1, %v1364_v23, %v498_v52  ;;  %vm515_vm2 = vweird.f32 %v1366_v50  ;;  %v1368_v17 = vpop.eup %1367  ;;  %v700_v23 = vpack.c.bf16 %v688_v44, %v687_v43  ;;  %v1302_v44 = vld [vmem:[%s1774_s2 + $0x4] sm:$0x1] }
 0x562   :  { %v507_v2 = vsel %vm504_vm3, %v506_v0, %v502_v61  ;;  %vm516_vm5 = vmor %vm514_vm4, %vm515_vm2  ;;  %v1370_v18 = vpop.eup %1369  ;;  %v699_v46 = vpack.c.bf16 %v686_v20, %v685_v45  ;;  %v697_v61 = vpack.c.bf16 %v682_v56, %v681_v55  ;;  %v668_v45 = vsub.f32 0.0, %v1302_v44 }
 0x563   :  { %v511_v58 = vsub.f32 1.0, %v510_v53  ;;  %v508_v6 = vmul.f32 %v507_v2, %v1629_v57  ;;  %v1321_v57 = vld [vmem:[%s1776_s4 + $0x3] ss:$0 sm:$0xff]  ;;  %v583_v24 = vpack.c.bf16 %v1370_v18, %v1368_v17  ;;  %712 = vmatpush.bf16.msrb.mxu2 %v700_v23  ;;  %v698_v53 = vpack.c.bf16 %v684_v48, %v683_v47 }
 0x564   :  { %v670_v20 = vperm.slane %v668_v45, 0 }
 0x565   :  { %v512_v62 = vmul.f32 %v1366_v50, %v511_v58 }
 0x566   :  { %v672_v23 = vmul.f32 %v670_v20, %v1581_v32 }
 0x567   :  { %v513_v1 = vadd.f32 %v1366_v50, %v512_v62  ;;  %713 = vmatpush.bf16.msrb.mxu2 %v699_v46  ;;  %v679_v62 = vld [vmem:[#allocation3 + $0x200] sm:$0xff]  ;;  %v673_v46 = vmul.f32 %v670_v20, %v1583_v34 }
 0x568   :  { %v674_v48 = vmul.f32 1.442695, %v672_v23 }
 0x569   :  { %v517_v4 = vsel %vm516_vm5, %v1366_v50, %v513_v1 }
 0x56a   :  { %v522_v5 = vsel %vm519_vm6, %v521_v3, %v517_v4  ;;  %v696_v4 = vpack.c.bf16 %v680_v63, %v679_v62 }
 0x56b   :  { %v523_v7 = vmul.f32 %v522_v5, %v1633_v60  ;;  %714 = vmatpush.bf16.msrb.mxu2 %v698_v53 }
 0x56d   :  { %v553_v8 = vpack.c.bf16 %v523_v7, %v508_v6 }
 0x56f   :  { %575 = vmatmul.bf16.vlgmr.msra.gmra.mxu3 %v553_v8  ;;  %715 = vmatpush.bf16.msrb.mxu2 %v697_v61 }
 0x573   :  { %716 = vmatpush.bf16.msrb.mxu2 %v696_v4  ;;  %v835_v4 = vld [vmem:[#allocation3 + $0x2f0] sm:$0xff] }
 0x5f2   :  { %v576_v12 = vpop.f32.mrf.mxu3 }
 0x5f3   :  { %v577_v60 = vadd.f32 %v1321_v57, %v576_v12 }
 0x5f5   :  { %v581_v19 = vmax.f32 %v577_v60, 0.0 }
 0x5fa   :  { %v578_v15 = vpop.f32.mrf.mxu3 }
 0x5fb   :  { %v579_v16 = vadd.f32 %v1321_v57, %v578_v15 }
 0x5fd   :  { %v582_v21 = vmax.f32 %v579_v16, 0.0 }
 0x5ff   :  { %v584_v22 = vpack.c.bf16 %v582_v21, %v581_v19 }
 0x601   :  { %595 = vmatpush.bf16.msrb.mxu0 %v584_v22 }
 0x604   :  { %1301 = vmatmul.msk.bf16.vlgmr.msrb.gmra.mxu0 %vm158_vm0, %v583_v24 }
 0x681   :  { %v597_v25 = vpop.f32.mrf.mxu0 }
 0x682   :  { %v1648_v26 = vadd.f32 %v597_v25, %v581_v19 }
 0x684   :  { %v604_v27 = vmul.f32 %v1648_v26, %v1648_v26 }
 0x686   :  { %606 = vadd.xlane.f32.xlu0 %v604_v27 }
 0x689   :  { %v599_v28 = vpop.f32.mrf.mxu0 }
 0x68a   :  { %v1652_v29 = vadd.f32 %v599_v28, %v582_v21 }
 0x68c   :  { %v605_v30 = vmul.f32 %v1652_v29, %v1652_v29 }
 0x68e   :  { %608 = vadd.xlane.f32.xlu1 %v605_v30 }
 0x6f9   :  { %v607_v42 = vpop.xlane.xlu0 %606 }
 0x6fa   :  { %1371 = vrsqrt.f32 %v607_v42  ;;  %vm617_vm7 = vcmp.eq.f32.partialorder %v607_v42, inf  ;;  %v620_v7 = vand.u32 2147483648, %v607_v42  ;;  %vm619_vm8 = vcmp.eq.f32.partialorder %v607_v42, 0.0 }
 0x700   :  { %v1372_v49 = vpop.eup %1371 }
 0x701   :  { %v611_v50 = vmul.f32 %v1372_v49, %v607_v42  ;;  %v609_v52 = vpop.xlane.xlu1 %608 }
 0x702   :  { %1373 = vrsqrt.f32 %v609_v52  ;;  %vm629_vm9 = vcmp.eq.f32.partialorder %v609_v52, inf  ;;  %v632_v13 = vand.u32 2147483648, %v609_v52  ;;  %vm631_vm10 = vcmp.eq.f32.partialorder %v609_v52, 0.0 }
 0x703   :  { %v612_v58 = vmul.f32 %v1372_v49, %v611_v50 }
 0x705   :  { %v613_v59 = vmul.f32 0.5, %v612_v58 }
 0x707   :  { %v614_v0 = vsub.f32 1.5, %v613_v59 }
 0x708   :  { %v1374_v1 = vpop.eup %1373 }
 0x709   :  { %v615_v2 = vmul.f32 %v1372_v49, %v614_v0  ;;  %v623_v3 = vmul.f32 %v1374_v1, %v609_v52  ;;  %v676_v49 = vmul.f32 1.442695, %v673_v46 }
 0x70b   :  { %v616_v5 = vmul.f32 %v615_v2, %v607_v42  ;;  %v624_v6 = vmul.f32 %v1374_v1, %v623_v3 }
 0x70d   :  { %v618_v8 = vsel %vm617_vm7, %v607_v42, %v616_v5  ;;  %v625_v9 = vmul.f32 0.5, %v624_v6  ;;  %v836_v5 = vld [vmem:[#allocation3 + $0x2f8] sm:$0xff] }
 0x70e   :  { %v621_v10 = vsel %vm619_vm8, %v620_v7, %v618_v8  ;;  %v845_v6 = vpack.c.bf16 %v836_v5, %v835_v4  ;;  %v833_v7 = vld [vmem:[#allocation3 + $0x2e0] sm:$0xff]  ;;  %v834_v8 = vld [vmem:[#allocation3 + $0x2e8] sm:$0xff] }
 0x70f   :  { %v634_v51 = vmax.f32 %v621_v10, 1e-12  ;;  %v626_v54 = vsub.f32 1.5, %v625_v9  ;;  %v844_v9 = vpack.c.bf16 %v834_v8, %v833_v7  ;;  %v831_v10 = vld [vmem:[#allocation3 + $0x2d0] sm:$0xff] }
 0x710   :  { %851 = vmatpush.bf16.msra.mxu0 %v845_v6 }
 0x711   :  { %1375 = vrcp.f32 %v634_v51  ;;  %v627_v11 = vmul.f32 %v1374_v1, %v626_v54  ;;  %v647_v24 = vand.u32 2147483648, %v634_v51  ;;  %vm641_vm12 = vweird.f32 %v634_v51 }
 0x712   :  { %v645_v25 = vand.u32 2147483647, %v634_v51 }
 0x713   :  { %v628_v12 = vmul.f32 %v627_v11, %v609_v52  ;;  %v648_v35 = vor.u32 1.1754944e-38, %v647_v24  ;;  %v823_v24 = vld [vmem:[#allocation3 + $0x290] sm:$0xff] }
 0x714   :  { %vm646_vm15 = vcmp.eq.f32.partialorder %v645_v25, 8.507059e+37  ;;  %852 = vmatpush.bf16.msra.mxu0 %v844_v9  ;;  %v824_v25 = vld [vmem:[#allocation3 + $0x298] sm:$0xff] }
 0x715   :  { %v630_v14 = vsel %vm629_vm9, %v609_v52, %v628_v12  ;;  %v829_v12 = vld [vmem:[#allocation3 + $0x2c0] sm:$0xff] }
 0x716   :  { %v633_v57 = vsel %vm631_vm10, %v632_v13, %v630_v14  ;;  %v830_v13 = vld [vmem:[#allocation3 + $0x2c8] sm:$0xff]  ;;  %v827_v14 = vld [vmem:[#allocation3 + $0x2b0] sm:$0xff] }
 0x717   :  { %v1376_v60 = vpop.eup %1375  ;;  %v635_v15 = vmax.f32 %v633_v57, 1e-12  ;;  %v828_v57 = vld [vmem:[#allocation3 + $0x2b8] sm:$0xff] }
 0x718   :  { %v637_v16 = vmul.f32 %v1376_v60, %v634_v51  ;;  %vm642_vm11 = vweird.f32 %v1376_v60  ;;  %v832_v51 = vld [vmem:[#allocation3 + $0x2d8] sm:$0xff] }
 0x719   :  { %1377 = vrcp.f32 %v635_v15  ;;  %vm643_vm13 = vmor %vm641_vm12, %vm642_vm11  ;;  %v662_v28 = vand.u32 2147483648, %v635_v15  ;;  %v660_v33 = vand.u32 2147483647, %v635_v15  ;;  %vm656_vm1 = vweird.f32 %v635_v15 }
 0x71a   :  { %v638_v17 = vsub.f32 1.0, %v637_v16  ;;  %1379 = vpow2.f32 %v674_v48  ;;  %v843_v54 = vpack.c.bf16 %v832_v51, %v831_v10  ;;  %v825_v16 = vld [vmem:[#allocation3 + $0x2a0] sm:$0xff] }
 0x71b   :  { %v663_v38 = vor.u32 1.1754944e-38, %v662_v28  ;;  %vm661_vm3 = vcmp.eq.f32.partialorder %v660_v33, 8.507059e+37  ;;  %1381 = vpow2.f32 %v676_v49  ;;  %v822_v33 = vld [vmem:[#allocation3 + $0x288] sm:$0xff] }
 0x71c   :  { %v639_v18 = vmul.f32 %v1376_v60, %v638_v17  ;;  %853 = vmatpush.bf16.msra.mxu0 %v843_v54  ;;  %v826_v17 = vld [vmem:[#allocation3 + $0x2a8] sm:$0xff] }
 0x71e   :  { %v640_v21 = vadd.f32 %v1376_v60, %v639_v18 }
 0x71f   :  { %v1378_v19 = vpop.eup %1377 }
 0x720   :  { %v652_v22 = vmul.f32 %v1378_v19, %v635_v15  ;;  %v644_v30 = vsel %vm643_vm13, %v1376_v60, %v640_v21  ;;  %vm657_vm14 = vweird.f32 %v1378_v19  ;;  %v1380_v53 = vpop.eup %1379  ;;  %v842_v60 = vpack.c.bf16 %v830_v13, %v829_v12  ;;  %v1305_v13 = vld [vmem:[%s1774_s2 + $0x5] sm:$0x1] }
 0x721   :  { %v649_v37 = vsel %vm646_vm15, %v648_v35, %v644_v30  ;;  %vm658_vm2 = vmor %vm656_vm1, %vm657_vm14  ;;  %v1382_v55 = vpop.eup %1381  ;;  %v841_v15 = vpack.c.bf16 %v828_v57, %v827_v14  ;;  %v839_v30 = vpack.c.bf16 %v824_v25, %v823_v24  ;;  %v810_v14 = vsub.f32 0.0, %v1305_v13  ;;  %v1010_v13 = vld [vmem:[#allocation5 + $0xf0] sm:$0xff] }
 0x722   :  { %v653_v27 = vsub.f32 1.0, %v652_v22  ;;  %v650_v41 = vmul.f32 %v649_v37, %v1648_v26  ;;  %v1322_v26 = vld [vmem:[%s1776_s4 + $0x4] ss:$0 sm:$0xff]  ;;  %v725_v61 = vpack.c.bf16 %v1382_v55, %v1380_v53  ;;  %854 = vmatpush.bf16.msra.mxu0 %v842_v60  ;;  %v840_v22 = vpack.c.bf16 %v826_v17, %v825_v16 }
 0x723   :  { %v812_v57 = vperm.slane %v810_v14, 0  ;;  %v1011_v14 = vld [vmem:[#allocation5 + $0xf8] sm:$0xff] }
 0x724   :  { %v654_v31 = vmul.f32 %v1378_v19, %v653_v27 }
 0x725   :  { %v814_v60 = vmul.f32 %v812_v57, %v1581_v32 }
 0x726   :  { %v655_v36 = vadd.f32 %v1378_v19, %v654_v31  ;;  %855 = vmatpush.bf16.msra.mxu0 %v841_v15  ;;  %v821_v31 = vld [vmem:[#allocation3 + $0x280] sm:$0xff]  ;;  %v815_v15 = vmul.f32 %v812_v57, %v1583_v34 }
 0x727   :  { %v816_v17 = vmul.f32 1.442695, %v814_v60  ;;  %v1008_v57 = vld [vmem:[#allocation5 + $0xe0] sm:$0xff] }
 0x728   :  { %v659_v39 = vsel %vm658_vm2, %v1378_v19, %v655_v36 }
 0x729   :  { %v664_v40 = vsel %vm661_vm3, %v663_v38, %v659_v39  ;;  %v838_v39 = vpack.c.bf16 %v822_v33, %v821_v31 }
 0x72a   :  { %v665_v42 = vmul.f32 %v664_v40, %v1652_v29  ;;  %856 = vmatpush.bf16.msra.mxu0 %v840_v22 }
 0x72c   :  { %v695_v43 = vpack.c.bf16 %v665_v42, %v650_v41 }
 0x72e   :  { %717 = vmatmul.bf16.vlgmr.msrb.gmra.mxu2 %v695_v43  ;;  %857 = vmatpush.bf16.msra.mxu0 %v839_v30 }
 0x732   :  { %858 = vmatpush.bf16.msra.mxu0 %v838_v39 }
 0x7b1   :  { %v718_v47 = vpop.f32.mrf.mxu2 }
 0x7b2   :  { %v719_v29 = vadd.f32 %v1322_v26, %v718_v47 }
 0x7b4   :  { %v723_v56 = vmax.f32 %v719_v29, 0.0 }
 0x7b9   :  { %v720_v50 = vpop.f32.mrf.mxu2 }
 0x7ba   :  { %v721_v52 = vadd.f32 %v1322_v26, %v720_v50 }
 0x7bc   :  { %v724_v58 = vmax.f32 %v721_v52, 0.0 }
 0x7be   :  { %v726_v59 = vpack.c.bf16 %v724_v58, %v723_v56 }
 0x7c0   :  { %737 = vmatpush.bf16.msra.mxu1 %v726_v59 }
 0x7c3   :  { %1304 = vmatmul.msk.bf16.vlgmr.msra.gmra.mxu1 %vm158_vm0, %v725_v61 }
 0x840   :  { %v739_v62 = vpop.f32.mrf.mxu1 }
 0x841   :  { %v1667_v63 = vadd.f32 %v739_v62, %v723_v56 }
 0x843   :  { %v746_v0 = vmul.f32 %v1667_v63, %v1667_v63 }
 0x845   :  { %748 = vadd.xlane.f32.xlu2 %v746_v0 }
 0x848   :  { %v741_v1 = vpop.f32.mrf.mxu1 }
 0x849   :  { %v1671_v2 = vadd.f32 %v741_v1, %v724_v58 }
 0x84b   :  { %v747_v3 = vmul.f32 %v1671_v2, %v1671_v2 }
 0x84d   :  { %750 = vadd.xlane.f32.xlu0 %v747_v3 }
 0x8b8   :  { %v749_v11 = vpop.xlane.xlu2 %748 }
 0x8b9   :  { %1383 = vrsqrt.f32 %v749_v11  ;;  %vm759_vm4 = vcmp.eq.f32.partialorder %v749_v11, inf  ;;  %v762_v42 = vand.u32 2147483648, %v749_v11  ;;  %vm761_vm5 = vcmp.eq.f32.partialorder %v749_v11, 0.0 }
 0x8bf   :  { %v1384_v18 = vpop.eup %1383 }
 0x8c0   :  { %v753_v19 = vmul.f32 %v1384_v18, %v749_v11  ;;  %v751_v21 = vpop.xlane.xlu0 %750 }
 0x8c1   :  { %1385 = vrsqrt.f32 %v751_v21  ;;  %vm771_vm6 = vcmp.eq.f32.partialorder %v751_v21, inf  ;;  %v774_v48 = vand.u32 2147483648, %v751_v21  ;;  %vm773_vm7 = vcmp.eq.f32.partialorder %v751_v21, 0.0 }
 0x8c2   :  { %v754_v27 = vmul.f32 %v1384_v18, %v753_v19 }
 0x8c4   :  { %v755_v28 = vmul.f32 0.5, %v754_v27 }
 0x8c6   :  { %v756_v35 = vsub.f32 1.5, %v755_v28 }
 0x8c7   :  { %v1386_v36 = vpop.eup %1385 }
 0x8c8   :  { %v757_v37 = vmul.f32 %v1384_v18, %v756_v35  ;;  %v765_v38 = vmul.f32 %v1386_v36, %v751_v21  ;;  %v818_v18 = vmul.f32 1.442695, %v815_v15 }
 0x8ca   :  { %v758_v40 = vmul.f32 %v757_v37, %v749_v11  ;;  %v766_v41 = vmul.f32 %v1386_v36, %v765_v38  ;;  %v964_v37 = vld [vmem:[#allocation5 + $0x70] sm:$0xff]  ;;  %v965_v38 = vld [vmem:[#allocation5 + $0x78] sm:$0xff] }
 0x8cb   :  { %v974_v39 = vpack.c.bf16 %v965_v38, %v964_v37 }
 0x8cc   :  { %v760_v43 = vsel %vm759_vm4, %v749_v11, %v758_v40  ;;  %v767_v44 = vmul.f32 0.5, %v766_v41  ;;  %v962_v40 = vld [vmem:[#allocation5 + $0x60] sm:$0xff]  ;;  %v963_v41 = vld [vmem:[#allocation5 + $0x68] sm:$0xff] }
 0x8cd   :  { %v763_v45 = vsel %vm761_vm5, %v762_v42, %v760_v43  ;;  %979 = vmatpush.bf16.msrb.mxu3 %v974_v39  ;;  %v973_v42 = vpack.c.bf16 %v963_v41, %v962_v40  ;;  %v960_v43 = vld [vmem:[#allocation5 + $0x50] sm:$0xff] }
 0x8ce   :  { %v776_v20 = vmax.f32 %v763_v45, 1e-12  ;;  %v768_v23 = vsub.f32 1.5, %v767_v44  ;;  %v961_v44 = vld [vmem:[#allocation5 + $0x58] sm:$0xff] }
 0x8cf   :  { %v972_v45 = vpack.c.bf16 %v961_v44, %v960_v43 }
 0x8d0   :  { %1387 = vrcp.f32 %v776_v20  ;;  %v769_v46 = vmul.f32 %v1386_v36, %v768_v23  ;;  %v789_v61 = vand.u32 2147483648, %v776_v20  ;;  %vm783_vm9 = vweird.f32 %v776_v20  ;;  %v958_v23 = vld [vmem:[#allocation5 + $0x40] sm:$0xff] }
 0x8d1   :  { %v787_v62 = vand.u32 2147483647, %v776_v20  ;;  %980 = vmatpush.bf16.msrb.mxu3 %v973_v42 }
 0x8d2   :  { %v770_v47 = vmul.f32 %v769_v46, %v751_v21  ;;  %v790_v6 = vor.u32 1.1754944e-38, %v789_v61  ;;  %v959_v46 = vld [vmem:[#allocation5 + $0x48] sm:$0xff] }
 0x8d3   :  { %vm788_vm12 = vcmp.eq.f32.partialorder %v787_v62, 8.507059e+37 }
 0x8d4   :  { %v772_v49 = vsel %vm771_vm6, %v751_v21, %v770_v47  ;;  %v956_v47 = vld [vmem:[#allocation5 + $0x30] sm:$0xff] }
 0x8d5   :  { %v775_v26 = vsel %vm773_vm7, %v774_v48, %v772_v49  ;;  %981 = vmatpush.bf16.msrb.mxu3 %v972_v45  ;;  %v957_v48 = vld [vmem:[#allocation5 + $0x38] sm:$0xff]  ;;  %v971_v49 = vpack.c.bf16 %v959_v46, %v958_v23 }
 0x8d6   :  { %v1388_v29 = vpop.eup %1387  ;;  %v777_v50 = vmax.f32 %v775_v26, 1e-12  ;;  %v970_v26 = vpack.c.bf16 %v957_v48, %v956_v47 }
 0x8d7   :  { %v779_v52 = vmul.f32 %v1388_v29, %v776_v20  ;;  %vm784_vm8 = vweird.f32 %v1388_v29 }
 0x8d8   :  { %1389 = vrcp.f32 %v777_v50  ;;  %vm785_vm10 = vmor %vm783_vm9, %vm784_vm8  ;;  %v804_v1 = vand.u32 2147483648, %v777_v50  ;;  %v802_v5 = vand.u32 2147483647, %v777_v50  ;;  %vm798_vm13 = vweird.f32 %v777_v50 }
 0x8d9   :  { %v780_v53 = vsub.f32 1.0, %v779_v52  ;;  %1391 = vpow2.f32 %v816_v17  ;;  %982 = vmatpush.bf16.msrb.mxu3 %v971_v49  ;;  %v1009_v17 = vld [vmem:[#allocation5 + $0xe8] sm:$0xff] }
 0x8da   :  { %v805_v9 = vor.u32 1.1754944e-38, %v804_v1  ;;  %vm803_vm15 = vcmp.eq.f32.partialorder %v802_v5, 8.507059e+37  ;;  %1393 = vpow2.f32 %v818_v18  ;;  %v950_v1 = vld [vmem:[#allocation5] sm:$0xff] }
 0x8db   :  { %v781_v55 = vmul.f32 %v1388_v29, %v780_v53 }
 0x8dd   :  { %v782_v58 = vadd.f32 %v1388_v29, %v781_v55  ;;  %983 = vmatpush.bf16.msrb.mxu3 %v970_v26 }
 0x8de   :  { %v1390_v56 = vpop.eup %1389 }
 0x8df   :  { %v794_v59 = vmul.f32 %v1390_v56, %v777_v50  ;;  %v786_v3 = vsel %vm785_vm10, %v1388_v29, %v782_v58  ;;  %vm799_vm11 = vweird.f32 %v1390_v56  ;;  %v1392_v22 = vpop.eup %1391  ;;  %v954_v29 = vld [vmem:[#allocation5 + $0x20] sm:$0xff]  ;;  %v955_v50 = vld [vmem:[#allocation5 + $0x28] sm:$0xff]  ;;  %v952_v58 = vld [vmem:[#allocation5 + $0x10] sm:$0xff] }
 0x8e0   :  { %v791_v8 = vsel %vm788_vm12, %v790_v6, %v786_v3  ;;  %vm800_vm14 = vmor %vm798_vm13, %vm799_vm11  ;;  %v1394_v24 = vpop.eup %1393  ;;  %v951_v3 = vld [vmem:[#allocation5 + $0x8] sm:$0xff] }
 0x8e1   :  { %v795_v0 = vsub.f32 1.0, %v794_v59  ;;  %v792_v54 = vmul.f32 %v791_v8, %v1667_v63  ;;  %v1323_v63 = vld [vmem:[%s1776_s4 + $0x5] ss:$0 sm:$0xff]  ;;  %v867_v32 = vpack.c.bf16 %v1394_v24, %v1392_v22  ;;  %v953_v59 = vld [vmem:[#allocation5 + $0x18] sm:$0xff]  ;;  %v967_v8 = vpack.c.bf16 %v951_v3, %v950_v1  ;;  %v998_v1 = vld [vmem:[#allocation5 + $0x90] sm:$0xff] }
 0x8e2   :  { %v999_v3 = vld [vmem:[#allocation5 + $0x98] sm:$0xff] }
 0x8e3   :  { %v796_v4 = vmul.f32 %v1390_v56, %v795_v0  ;;  %v968_v0 = vpack.c.bf16 %v953_v59, %v952_v58  ;;  %v1003_v58 = vld [vmem:[#allocation5 + $0xb8] sm:$0xff] }
 0x8e5   :  { %v797_v7 = vadd.f32 %v1390_v56, %v796_v4 }
 0x8e7   :  { %v801_v10 = vsel %vm800_vm14, %v1390_v56, %v797_v7  ;;  %v969_v56 = vpack.c.bf16 %v955_v50, %v954_v29 }
 0x8e8   :  { %v806_v51 = vsel %vm803_vm15, %v805_v9, %v801_v10 }
 0x8e9   :  { %v807_v11 = vmul.f32 %v806_v51, %v1671_v2  ;;  %984 = vmatpush.bf16.msrb.mxu3 %v969_v56  ;;  %v1002_v56 = vld [vmem:[#allocation5 + $0xb0] sm:$0xff] }
 0x8ea   :  { %v1016_v59 = vpack.c.bf16 %v1003_v58, %v1002_v56  ;;  %v1115_v56 = vld [vmem:[#allocation7 + $0x30] sm:$0xff]  ;;  %v1116_v58 = vld [vmem:[#allocation7 + $0x38] sm:$0xff] }
 0x8eb   :  { %v837_v12 = vpack.c.bf16 %v807_v11, %v792_v54 }
 0x8ed   :  { %859 = vmatmul.bf16.vlgmr.msra.gmra.mxu0 %v837_v12  ;;  %985 = vmatpush.bf16.msrb.mxu3 %v968_v0 }
 0x8f1   :  { %986 = vmatpush.bf16.msrb.mxu3 %v967_v8  ;;  %v1055_v8 = vld [vmem:[#allocation5 + $0x160] sm:$0xff] }
 0x96a   :  { %v860_v16 = vpop.f32.mrf.mxu0 }
 0x96b   :  { %v861_v2 = vadd.f32 %v1323_v63, %v860_v16  ;;  %v1020_v16 = vpack.c.bf16 %v1011_v14, %v1010_v13  ;;  %v1051_v13 = vld [vmem:[#allocation5 + $0x140] sm:$0xff]  ;;  %v1052_v14 = vld [vmem:[#allocation5 + $0x148] sm:$0xff] }
 0x96d   :  { %v865_v25 = vmax.f32 %v861_v2, 0.0  ;;  %1026 = vmatpush.bf16.msra.mxu2 %v1020_v16  ;;  %v1006_v2 = vld [vmem:[#allocation5 + $0xd0] sm:$0xff] }
 0x972   :  { %v862_v19 = vpop.f32.mrf.mxu0 }
 0x973   :  { %v863_v21 = vadd.f32 %v1323_v63, %v862_v19  ;;  %v1019_v63 = vpack.c.bf16 %v1009_v17, %v1008_v57  ;;  %v1007_v19 = vld [vmem:[#allocation5 + $0xd8] sm:$0xff]  ;;  %v1064_v57 = vpack.c.bf16 %v1052_v14, %v1051_v13  ;;  %v1167_v14 = vld [vmem:[#allocation7 + $0xf0] sm:$0xff] }
 0x975   :  { %v866_v27 = vmax.f32 %v863_v21, 0.0  ;;  %1027 = vmatpush.bf16.msra.mxu2 %v1019_v63 }
 0x977   :  { %v868_v28 = vpack.c.bf16 %v866_v27, %v865_v25 }
 0x979   :  { %879 = vmatpush.bf16.msrb.mxu1 %v868_v28  ;;  %v1004_v28 = vld [vmem:[#allocation5 + $0xc0] sm:$0xff] }
 0x97c   :  { %1307 = vmatmul.msk.bf16.vlgmr.msrb.gmra.mxu1 %vm158_vm0, %v867_v32  ;;  %v1005_v32 = vld [vmem:[#allocation5 + $0xc8] sm:$0xff] }
 0x9f9   :  { %v881_v34 = vpop.f32.mrf.mxu1 }
 0x9fa   :  { %v1686_v30 = vadd.f32 %v881_v34, %v865_v25  ;;  %v1018_v25 = vpack.c.bf16 %v1007_v19, %v1006_v2 }
 0x9fc   :  { %v888_v31 = vmul.f32 %v1686_v30, %v1686_v30  ;;  %1028 = vmatpush.bf16.msra.mxu2 %v1018_v25  ;;  %v1047_v25 = vld [vmem:[#allocation5 + $0x120] sm:$0xff] }
 0x9fe   :  { %890 = vadd.xlane.f32.xlu1 %v888_v31 }
 0xa01   :  { %v883_v33 = vpop.f32.mrf.mxu1 }
 0xa02   :  { %v1690_v35 = vadd.f32 %v883_v33, %v866_v27 }
 0xa04   :  { %v889_v36 = vmul.f32 %v1690_v35, %v1690_v35 }
 0xa06   :  { %892 = vadd.xlane.f32.xlu2 %v889_v36  ;;  %v1017_v36 = vpack.c.bf16 %v1005_v32, %v1004_v28  ;;  %v1045_v32 = vld [vmem:[#allocation5 + $0x110] sm:$0xff] }
 0xa08   :  { %1029 = vmatpush.bf16.msra.mxu2 %v1017_v36  ;;  %v1044_v36 = vld [vmem:[#allocation5 + $0x108] sm:$0xff] }
 0xa0c   :  { %1030 = vmatpush.bf16.msra.mxu2 %v1016_v59 }
 0xa71   :  { %v891_v20 = vpop.xlane.xlu1 %890 }
 0xa72   :  { %1395 = vrsqrt.f32 %v891_v20  ;;  %vm901_vm1 = vcmp.eq.f32.partialorder %v891_v20, inf  ;;  %v904_v51 = vand.u32 2147483648, %v891_v20  ;;  %vm903_vm2 = vcmp.eq.f32.partialorder %v891_v20, 0.0 }
 0xa78   :  { %v1396_v52 = vpop.eup %1395 }
 0xa79   :  { %v895_v53 = vmul.f32 %v1396_v52, %v891_v20  ;;  %v893_v55 = vpop.xlane.xlu2 %892 }
 0xa7a   :  { %1397 = vrsqrt.f32 %v893_v55  ;;  %vm913_vm3 = vcmp.eq.f32.partialorder %v893_v55, inf  ;;  %v916_v22 = vand.u32 2147483648, %v893_v55  ;;  %vm915_vm4 = vcmp.eq.f32.partialorder %v893_v55, 0.0 }
 0xa7b   :  { %v896_v61 = vmul.f32 %v1396_v52, %v895_v53 }
 0xa7d   :  { %v897_v62 = vmul.f32 0.5, %v896_v61  ;;  %v1000_v61 = vld [vmem:[#allocation5 + $0xa0] sm:$0xff] }
 0xa7f   :  { %v898_v4 = vsub.f32 1.5, %v897_v62  ;;  %v1001_v62 = vld [vmem:[#allocation5 + $0xa8] sm:$0xff] }
 0xa80   :  { %v1398_v5 = vpop.eup %1397  ;;  %v1015_v0 = vpack.c.bf16 %v1001_v62, %v1000_v61  ;;  %v1129_v61 = vpack.c.bf16 %v1116_v58, %v1115_v56  ;;  %v1113_v62 = vld [vmem:[#allocation7 + $0x20] sm:$0xff]  ;;  %v1205_v56 = vld [vmem:[#allocation7 + $0x138] sm:$0xff] }
 0xa81   :  { %v899_v6 = vmul.f32 %v1396_v52, %v898_v4  ;;  %v907_v7 = vmul.f32 %v1398_v5, %v893_v55  ;;  %v1014_v4 = vpack.c.bf16 %v999_v3, %v998_v1  ;;  %v1326_v1 = vld [vmem:[%s1778_s6 + $0x2] ss:$0 sm:$0xff] }
 0xa82   :  { %1031 = vmatpush.bf16.msra.mxu2 %v1015_v0  ;;  %v1114_v0 = vld [vmem:[#allocation7 + $0x28] sm:$0xff] }
 0xa83   :  { %v900_v9 = vmul.f32 %v899_v6, %v891_v20  ;;  %v908_v10 = vmul.f32 %v1398_v5, %v907_v7  ;;  %v997_v6 = vld [vmem:[#allocation5 + $0x88] sm:$0xff]  ;;  %v1128_v3 = vpack.c.bf16 %v1114_v0, %v1113_v62  ;;  %v1327_v0 = vld [vmem:[%s1782_s10] ss:$0 sm:$0xff] }
 0xa85   :  { %v902_v54 = vsel %vm901_vm1, %v891_v20, %v900_v9  ;;  %v909_v11 = vmul.f32 0.5, %v908_v10  ;;  %v1056_v10 = vld [vmem:[#allocation5 + $0x168] sm:$0xff] }
 0xa86   :  { %v905_v12 = vsel %vm903_vm2, %v904_v51, %v902_v54  ;;  %1032 = vmatpush.bf16.msra.mxu2 %v1014_v4  ;;  %v1066_v51 = vpack.c.bf16 %v1056_v10, %v1055_v8  ;;  %v1053_v54 = vld [vmem:[#allocation5 + $0x150] sm:$0xff]  ;;  %v1089_v10 = vld [vmem:[%s1779_s7] sm:$0x7] }
 0xa87   :  { %v918_v60 = vmax.f32 %v905_v12, 1e-12  ;;  %v910_v15 = vsub.f32 1.5, %v909_v11  ;;  %v1054_v11 = vld [vmem:[#allocation5 + $0x158] sm:$0xff]  ;;  %v1111_v4 = vld [vmem:[#allocation7 + $0x10] sm:$0xff] }
 0xa88   :  { %v1065_v12 = vpack.c.bf16 %v1054_v11, %v1053_v54  ;;  %v1090_v54 = vpack.c.bf16 %v1089_v10, %v1089_v10  ;;  %v1109_v11 = vld [vmem:[#allocation7] sm:$0xff] }
 0xa89   :  { %1399 = vrcp.f32 %v918_v60  ;;  %v911_v18 = vmul.f32 %v1398_v5, %v910_v15  ;;  %v931_v42 = vand.u32 2147483648, %v918_v60  ;;  %vm925_vm6 = vweird.f32 %v918_v60  ;;  %v996_v5 = vld [vmem:[#allocation5 + $0x80] sm:$0xff]  ;;  %v1324_v15 = vld [vmem:[%s1778_s6] ss:$0 sm:$0xff] }
 0xa8a   :  { %v929_v43 = vand.u32 2147483647, %v918_v60  ;;  %v1013_v7 = vpack.c.bf16 %v997_v6, %v996_v5  ;;  %v1112_v5 = vld [vmem:[#allocation7 + $0x18] sm:$0xff] }
 0xa8b   :  { %v912_v21 = vmul.f32 %v911_v18, %v893_v55  ;;  %v932_v47 = vor.u32 1.1754944e-38, %v931_v42 }
 0xa8c   :  { %vm930_vm9 = vcmp.eq.f32.partialorder %v929_v43, 8.507059e+37  ;;  %1033 = vmatpush.bf16.msra.mxu2 %v1013_v7 }
 0xa8d   :  { %v914_v24 = vsel %vm913_vm3, %v893_v55, %v912_v21  ;;  %v1049_v21 = vld [vmem:[#allocation5 + $0x130] sm:$0xff] }
 0xa8e   :  { %v917_v27 = vsel %vm915_vm4, %v916_v22, %v914_v24  ;;  %v1050_v22 = vld [vmem:[#allocation5 + $0x138] sm:$0xff] }
 0xa8f   :  { %v1400_v34 = vpop.eup %1399  ;;  %v919_v31 = vmax.f32 %v917_v27, 1e-12  ;;  %v1063_v24 = vpack.c.bf16 %v1050_v22, %v1049_v21  ;;  %v1048_v27 = vld [vmem:[#allocation5 + $0x128] sm:$0xff] }
 0xa90   :  { %v921_v33 = vmul.f32 %v1400_v34, %v918_v60  ;;  %vm926_vm5 = vweird.f32 %v1400_v34  ;;  %v1062_v28 = vpack.c.bf16 %v1048_v27, %v1047_v25  ;;  %v1162_v21 = vld [vmem:[#allocation7 + $0xc8] sm:$0xff]  ;;  %v1160_v25 = vld [vmem:[#allocation7 + $0xb8] sm:$0xff] }
 0xa91   :  { %1401 = vrcp.f32 %v919_v31  ;;  %vm927_vm7 = vmor %vm925_vm6, %vm926_vm5  ;;  %v946_v45 = vand.u32 2147483648, %v919_v31  ;;  %v944_v46 = vand.u32 2147483647, %v919_v31  ;;  %vm940_vm10 = vweird.f32 %v919_v31 }
 0xa92   :  { %v922_v37 = vsub.f32 1.0, %v921_v33  ;;  %v1043_v33 = vld [vmem:[#allocation5 + $0x100] sm:$0xff] }
 0xa93   :  { %v947_v26 = vor.u32 1.1754944e-38, %v946_v45  ;;  %vm945_vm12 = vcmp.eq.f32.partialorder %v944_v46, 8.507059e+37  ;;  %v1121_v46 = vld [vmem:[#allocation7 + $0x60] sm:$0xff] }
 0xa94   :  { %v923_v38 = vmul.f32 %v1400_v34, %v922_v37  ;;  %v1060_v37 = vpack.c.bf16 %v1044_v36, %v1043_v33 }
 0xa96   :  { %v924_v40 = vadd.f32 %v1400_v34, %v923_v38 }
 0xa97   :  { %v1402_v39 = vpop.eup %1401 }
 0xa98   :  { %v936_v41 = vmul.f32 %v1402_v39, %v919_v31  ;;  %v928_v20 = vsel %vm927_vm7, %v1400_v34, %v924_v40  ;;  %vm941_vm8 = vweird.f32 %v1402_v39  ;;  %v1046_v34 = vld [vmem:[#allocation5 + $0x118] sm:$0xff] }
 0xa99   :  { %v933_v49 = vsel %vm930_vm9, %v932_v47, %v928_v20  ;;  %vm942_vm11 = vmor %vm940_vm10, %vm941_vm8  ;;  %v1061_v31 = vpack.c.bf16 %v1046_v34, %v1045_v32  ;;  %v1123_v20 = vld [vmem:[#allocation7 + $0x70] sm:$0xff]  ;;  %v1158_v32 = vld [vmem:[#allocation7 + $0xa8] sm:$0xff] }
 0xa9a   :  { %v937_v44 = vsub.f32 1.0, %v936_v41  ;;  %v934_v52 = vmul.f32 %v933_v49, %v1686_v30  ;;  %v1057_v30 = vld [vmem:[#allocation5 + $0x170] sm:$0xff] }
 0xa9c   :  { %v938_v23 = vmul.f32 %v1402_v39, %v937_v44 }
 0xa9e   :  { %v939_v48 = vadd.f32 %v1402_v39, %v938_v23  ;;  %v1124_v23 = vld [vmem:[#allocation7 + $0x78] sm:$0xff] }
 0xa9f   :  { %v1133_v47 = vpack.c.bf16 %v1124_v23, %v1123_v20  ;;  %v1213_v20 = vld [vmem:[#allocation7 + $0x178] sm:$0xff]  ;;  %v1210_v23 = vld [vmem:[#allocation7 + $0x160] sm:$0xff] }
 0xaa0   :  { %v943_v29 = vsel %vm942_vm11, %v1402_v39, %v939_v48  ;;  %v1325_v39 = vld [vmem:[%s1778_s6 + $0x1] ss:$0 sm:$0xff]  ;;  %v1122_v48 = vld [vmem:[#allocation7 + $0x68] sm:$0xff] }
 0xaa1   :  { %v948_v50 = vsel %vm945_vm12, %v947_v26, %v943_v29  ;;  %1138 = vmatpush.bf16.msra.mxu3 %v1133_v47  ;;  %v1132_v49 = vpack.c.bf16 %v1122_v48, %v1121_v46  ;;  %v1119_v26 = vld [vmem:[#allocation7 + $0x50] sm:$0xff]  ;;  %v1120_v29 = vld [vmem:[#allocation7 + $0x58] sm:$0xff]  ;;  %v1211_v47 = vld [vmem:[#allocation7 + $0x168] sm:$0xff] }
 0xaa2   :  { %v949_v53 = vmul.f32 %v948_v50, %v1690_v35  ;;  %v1058_v35 = vld [vmem:[#allocation5 + $0x178] sm:$0xff]  ;;  %v1131_v50 = vpack.c.bf16 %v1120_v29, %v1119_v26  ;;  %v1221_v48 = vpack.c.bf16 %v1211_v47, %v1210_v23 }
 0xaa3   :  { %v1067_v9 = vpack.c.bf16 %v1058_v35, %v1057_v30  ;;  %v1127_v35 = vpack.c.bf16 %v1112_v5, %v1111_v4  ;;  %v1209_v26 = vld [vmem:[#allocation7 + $0x158] sm:$0xff] }
 0xaa4   :  { %v966_v55 = vpack.c.bf16 %v949_v53, %v934_v52  ;;  %v1117_v52 = vld [vmem:[#allocation7 + $0x40] sm:$0xff]  ;;  %v1118_v53 = vld [vmem:[#allocation7 + $0x48] sm:$0xff]  ;;  %v1330_v23 = vld [vmem:[#allocation2] ss:$0 sm:$0xff] }
 0xaa5   :  { %1073 = vmatpush.bf16.msra.mxu1 %v1067_v9  ;;  %1139 = vmatpush.bf16.msra.mxu3 %v1132_v49  ;;  %v1208_v49 = vld [vmem:[#allocation7 + $0x150] sm:$0xff] }
 0xaa6   :  { %987 = vmatmul.bf16.vlgmr.msrb.gmra.mxu3 %v966_v55  ;;  %v1130_v55 = vpack.c.bf16 %v1118_v53, %v1117_v52  ;;  %v1220_v29 = vpack.c.bf16 %v1209_v26, %v1208_v49  ;;  %v1207_v52 = vld [vmem:[#allocation7 + $0x148] sm:$0xff] }
 0xaa9   :  { %1074 = vmatpush.bf16.msra.mxu1 %v1066_v51  ;;  %1140 = vmatpush.bf16.msra.mxu3 %v1131_v50  ;;  %v1206_v50 = vld [vmem:[#allocation7 + $0x140] sm:$0xff] }
 0xaaa   :  { %v1219_v53 = vpack.c.bf16 %v1207_v52, %v1206_v50 }
 0xaad   :  { %1075 = vmatpush.bf16.msra.mxu1 %v1065_v12  ;;  %1141 = vmatpush.bf16.msra.mxu3 %v1130_v55  ;;  %v1110_v12 = vld [vmem:[#allocation7 + $0x8] sm:$0xff]  ;;  %v1204_v55 = vld [vmem:[#allocation7 + $0x130] sm:$0xff] }
 0xaae   :  { %v1126_v13 = vpack.c.bf16 %v1110_v12, %v1109_v11  ;;  %v1218_v58 = vpack.c.bf16 %v1205_v56, %v1204_v55  ;;  %v1254_v11 = vld [vmem:[%s1783_s11 + $0x60] sm:$0xff] }
 0xab1   :  { %1076 = vmatpush.bf16.msra.mxu1 %v1064_v57  ;;  %1142 = vmatpush.bf16.msra.mxu3 %v1129_v61  ;;  %v1168_v57 = vld [vmem:[#allocation7 + $0xf8] sm:$0xff]  ;;  %v1203_v61 = vld [vmem:[#allocation7 + $0x128] sm:$0xff] }
 0xab5   :  { %1077 = vmatpush.bf16.msra.mxu1 %v1063_v24  ;;  %1143 = vmatpush.bf16.msra.mxu3 %v1128_v3  ;;  %v1159_v24 = vld [vmem:[#allocation7 + $0xb0] sm:$0xff] }
 0xab6   :  { %v1173_v27 = vpack.c.bf16 %v1160_v25, %v1159_v24  ;;  %v1328_v25 = vld [vmem:[%s1782_s10 + $0x1] ss:$0 sm:$0xff] }
 0xab9   :  { %1078 = vmatpush.bf16.msra.mxu1 %v1062_v28  ;;  %1144 = vmatpush.bf16.msra.mxu3 %v1127_v35  ;;  %v1157_v28 = vld [vmem:[#allocation7 + $0xa0] sm:$0xff] }
 0xaba   :  { %v1172_v34 = vpack.c.bf16 %v1158_v32, %v1157_v28 }
 0xabd   :  { %1079 = vmatpush.bf16.msra.mxu1 %v1061_v31  ;;  %1145 = vmatpush.bf16.msra.mxu3 %v1126_v13  ;;  %v1092_v31 = vld [vmem:[%s1780_s8] sm:$0x7]  ;;  %v1255_v13 = vld [vmem:[%s1783_s11 + $0x68] sm:$0xff] }
 0xac1   :  { %1080 = vmatpush.bf16.msra.mxu1 %v1060_v37 }
 0xb29   :  { %v988_v60 = vpop.f32.mrf.mxu3 }
 0xb2a   :  { %v989_v16 = vadd.f32 %v1324_v15, %v988_v60  ;;  %v1165_v60 = vld [vmem:[#allocation7 + $0xe0] sm:$0xff] }
 0xb2c   :  { %v993_v63 = vmax.f32 %v989_v16, 0.0  ;;  %v1166_v16 = vld [vmem:[#allocation7 + $0xe8] sm:$0xff] }
 0xb31   :  { %v990_v17 = vpop.f32.mrf.mxu3 }
 0xb32   :  { %v991_v18 = vadd.f32 %v1324_v15, %v990_v17  ;;  %v1177_v15 = vpack.c.bf16 %v1168_v57, %v1167_v14  ;;  %v1176_v17 = vpack.c.bf16 %v1166_v16, %v1165_v60  ;;  %v1265_v14 = vpack.c.bf16 %v1255_v13, %v1254_v11  ;;  %v1252_v57 = vld [vmem:[%s1783_s11 + $0x50] sm:$0xff]  ;;  %v1253_v60 = vld [vmem:[%s1783_s11 + $0x58] sm:$0xff]  ;;  %v1250_v16 = vld [vmem:[%s1783_s11 + $0x40] sm:$0xff] }
 0xb34   :  { %v994_v2 = vmax.f32 %v991_v18, 0.0  ;;  %v1163_v18 = vld [vmem:[#allocation7 + $0xd0] sm:$0xff] }
 0xb36   :  { %v1012_v19 = vpack.c.bf16 %v994_v2, %v993_v63  ;;  %v1164_v63 = vld [vmem:[#allocation7 + $0xd8] sm:$0xff] }
 0xb37   :  { %v1175_v2 = vpack.c.bf16 %v1164_v63, %v1163_v18  ;;  %v1248_v63 = vld [vmem:[%s1783_s11 + $0x30] sm:$0xff] }
 0xb38   :  { %1034 = vmatmul.bf16.vlgmr.msra.gmra.mxu2 %v1012_v19  ;;  %v1161_v19 = vld [vmem:[#allocation7 + $0xc0] sm:$0xff] }
 0xb39   :  { %v1174_v22 = vpack.c.bf16 %v1162_v21, %v1161_v19  ;;  %v1246_v21 = vld [vmem:[%s1783_s11 + $0x20] sm:$0xff] }
 0xbbb   :  { %v1035_v38 = vpop.f32.mrf.mxu2 }
 0xbbc   :  { %v1036_v40 = vadd.f32 %v1325_v39, %v1035_v38 }
 0xbbe   :  { %v1040_v43 = vmax.f32 %v1036_v40, 0.0  ;;  %v1156_v40 = vld [vmem:[#allocation7 + $0x98] sm:$0xff] }
 0xbc3   :  { %v1037_v41 = vpop.f32.mrf.mxu2 }
 0xbc4   :  { %v1038_v42 = vadd.f32 %v1325_v39, %v1037_v41  ;;  %v1155_v39 = vld [vmem:[#allocation7 + $0x90] sm:$0xff] }
 0xbc5   :  { %v1171_v41 = vpack.c.bf16 %v1156_v40, %v1155_v39  ;;  %v1243_v39 = vld [vmem:[%s1783_s11 + $0x8] sm:$0xff] }
 0xbc6   :  { %v1041_v44 = vmax.f32 %v1038_v42, 0.0  ;;  %v1153_v42 = vld [vmem:[#allocation7 + $0x80] sm:$0xff] }
 0xbc8   :  { %v1059_v45 = vpack.c.bf16 %v1041_v44, %v1040_v43  ;;  %v1154_v43 = vld [vmem:[#allocation7 + $0x88] sm:$0xff] }
 0xbc9   :  { %v1170_v44 = vpack.c.bf16 %v1154_v43, %v1153_v42 }
 0xbca   :  { %1081 = vmatmul.bf16.vlgmr.msra.gmra.mxu1 %v1059_v45  ;;  %v1212_v45 = vld [vmem:[#allocation7 + $0x170] sm:$0xff] }
 0xbcb   :  { %v1222_v46 = vpack.c.bf16 %v1213_v20, %v1212_v45 }
 0xbcd   :  { %1228 = vmatpush.bf16.msrb.mxu2 %v1222_v46 }
 0xbd1   :  { %1229 = vmatpush.bf16.msrb.mxu2 %v1221_v48 }
 0xbd5   :  { %1230 = vmatpush.bf16.msrb.mxu2 %v1220_v29 }
 0xbd9   :  { %1231 = vmatpush.bf16.msrb.mxu2 %v1219_v53 }
 0xbdd   :  { %1232 = vmatpush.bf16.msrb.mxu2 %v1218_v58 }
 0xc47   :  { %v1082_v59 = vpop.f32.mrf.mxu1 }
 0xc48   :  { %v1083_v6 = vadd.f32 %v1326_v1, %v1082_v59  ;;  %v1202_v59 = vld [vmem:[#allocation7 + $0x120] sm:$0xff] }
 0xc49   :  { %v1217_v62 = vpack.c.bf16 %v1203_v61, %v1202_v59 }
 0xc4a   :  { %v1087_v8 = vmax.f32 %v1083_v6, 0.0 }
 0xc4b   :  { %1233 = vmatpush.bf16.msrb.mxu2 %v1217_v62 }
 0xc4f   :  { %v1084_v7 = vpop.f32.mrf.mxu1 }
 0xc50   :  { %v1085_v30 = vadd.f32 %v1326_v1, %v1084_v7  ;;  %v1200_v7 = vld [vmem:[#allocation7 + $0x110] sm:$0xff] }
 0xc52   :  { %v1088_v9 = vmax.f32 %v1085_v30, 0.0  ;;  %v1201_v30 = vld [vmem:[#allocation7 + $0x118] sm:$0xff] }
 0xc53   :  { %v1216_v35 = vpack.c.bf16 %v1201_v30, %v1200_v7 }
 0xc54   :  { %v1091_v51 = vpack.c.bf16 %v1088_v9, %v1087_v8  ;;  %v1198_v8 = vld [vmem:[#allocation7 + $0x100] sm:$0xff]  ;;  %v1199_v9 = vld [vmem:[#allocation7 + $0x108] sm:$0xff] }
 0xc55   :  { %1234 = vmatpush.bf16.msrb.mxu2 %v1216_v35  ;;  %v1215_v10 = vpack.c.bf16 %v1199_v9, %v1198_v8 }
 0xc56   :  { %1103 = vmatpush.bf16.msrb.mxu0 %v1091_v51  ;;  %v1256_v51 = vld [vmem:[%s1783_s11 + $0x70] sm:$0xff] }
 0xc59   :  { %1310 = vmatmul.msk.bf16.vlgmr.msrb.gmra.mxu0 %vm158_vm0, %v1090_v54  ;;  %1235 = vmatpush.bf16.msrb.mxu2 %v1215_v10  ;;  %v1257_v54 = vld [vmem:[%s1783_s11 + $0x78] sm:$0xff]  ;;  %vm1284_vm0 = vcmask 2048  }
 0xc5a   :  { %1183 = vmatpush.bf16.msra.mxu0 %v1177_v15  ;;  %v1266_v12 = vpack.c.bf16 %v1257_v54, %v1256_v51  ;;  %v1264_v15 = vpack.c.bf16 %v1253_v60, %v1252_v57 }
 0xc5c   :  { %1271 = vmatpush.bf16.msrb.mxu1 %v1266_v12 }
 0xc5e   :  { %1184 = vmatpush.bf16.msra.mxu0 %v1176_v17  ;;  %v1251_v17 = vld [vmem:[%s1783_s11 + $0x48] sm:$0xff] }
 0xc5f   :  { %v1263_v18 = vpack.c.bf16 %v1251_v17, %v1250_v16 }
 0xc60   :  { %1272 = vmatpush.bf16.msrb.mxu1 %v1265_v14 }
 0xc62   :  { %1185 = vmatpush.bf16.msra.mxu0 %v1175_v2  ;;  %v1249_v2 = vld [vmem:[%s1783_s11 + $0x38] sm:$0xff] }
 0xc63   :  { %v1262_v19 = vpack.c.bf16 %v1249_v2, %v1248_v63 }
 0xc64   :  { %1273 = vmatpush.bf16.msrb.mxu1 %v1264_v15 }
 0xc66   :  { %1186 = vmatpush.bf16.msra.mxu0 %v1174_v22  ;;  %v1247_v22 = vld [vmem:[%s1783_s11 + $0x28] sm:$0xff] }
 0xc67   :  { %v1261_v24 = vpack.c.bf16 %v1247_v22, %v1246_v21 }
 0xc68   :  { %1274 = vmatpush.bf16.msrb.mxu1 %v1263_v18 }
 0xc6a   :  { %1187 = vmatpush.bf16.msra.mxu0 %v1173_v27 }
 0xc6c   :  { %1275 = vmatpush.bf16.msrb.mxu1 %v1262_v19 }
 0xc6e   :  { %1188 = vmatpush.bf16.msra.mxu0 %v1172_v34 }
 0xc70   :  { %1276 = vmatpush.bf16.msrb.mxu1 %v1261_v24 }
 0xc72   :  { %1189 = vmatpush.bf16.msra.mxu0 %v1171_v41  ;;  %v1329_v41 = vld [vmem:[%s1782_s10 + $0x2] ss:$0 sm:$0xff] }
 0xc76   :  { %1190 = vmatpush.bf16.msra.mxu0 %v1170_v44 }
 0xcd6   :  { %v1105_v33 = vpop.f32.mrf.mxu0 }
 0xcd7   :  { %v1106_v36 = vadd.f32 %v1105_v33, %v1092_v31  ;;  %v1244_v33 = vld [vmem:[%s1783_s11 + $0x10] sm:$0xff] }
 0xcd9   :  { %v1125_v37 = vpack.c.bf16 %v1106_v36, %v1106_v36  ;;  %v1245_v36 = vld [vmem:[%s1783_s11 + $0x18] sm:$0xff] }
 0xcdb   :  { %1146 = vmatmul.bf16.vlgmr.msra.gmra.mxu3 %v1125_v37  ;;  %v1260_v37 = vpack.c.bf16 %v1245_v36, %v1244_v33 }
 0xcdd   :  { %1277 = vmatpush.bf16.msrb.mxu1 %v1260_v37 }
 0xcde   :  { %v1107_v38 = vpop.f32.mrf.mxu0 }
 0xcdf   :  { %v1242_v38 = vld [vmem:[%s1783_s11] sm:$0xff] }
 0xce0   :  { %v1259_v40 = vpack.c.bf16 %v1243_v39, %v1242_v38 }
 0xce2   :  { %1278 = vmatpush.bf16.msrb.mxu1 %v1259_v40 }
 0xd5e   :  { %v1147_v1 = vpop.f32.mrf.mxu3 }
 0xd5f   :  { %v1148_v3 = vadd.f32 %v1327_v0, %v1147_v1 }
 0xd61   :  { %v1151_v4 = vmax.f32 %v1148_v3, 0.0 }
 0xd63   :  { %v1169_v5 = vpack.c.bf16 %v1151_v4, %v1151_v4 }
 0xd65   :  { %1191 = vmatmul.bf16.vlgmr.msra.gmra.mxu0 %v1169_v5 }
 0xd66   :  { %v1149_v6 = vpop.f32.mrf.mxu3 }
 0xde2   :  { %v1192_v27 = vpop.f32.mrf.mxu0 }
 0xde3   :  { %v1193_v28 = vadd.f32 %v1328_v25, %v1192_v27 }
 0xde5   :  { %v1196_v32 = vmax.f32 %v1193_v28, 0.0 }
 0xde7   :  { %v1214_v34 = vpack.c.bf16 %v1196_v32, %v1196_v32 }
 0xde9   :  { %1236 = vmatmul.bf16.vlgmr.msrb.gmra.mxu2 %v1214_v34 }
 0xdea   :  { %v1194_v31 = vpop.f32.mrf.mxu0 }
 0xe6c   :  { %v1237_v42 = vpop.f32.mrf.mxu2 }
 0xe6d   :  { %v1238_v43 = vadd.f32 %v1329_v41, %v1237_v42 }
 0xe6f   :  { %v1241_v44 = vmax.f32 %v1238_v43, 0.0 }
 0xe71   :  { %v1258_v45 = vpack.c.bf16 %v1241_v44, %v1241_v44 }
 0xe73   :  { %1279 = vmatmul.bf16.vlgmr.msrb.gmra.mxu1 %v1258_v45 }
 0xe74   :  { %v1239_v20 = vpop.f32.mrf.mxu2 }
 0xef0   :  { %v1280_v46 = vpop.f32.mrf.mxu1 }
 0xef1   :  { %v1281_v47 = vadd.f32 %v1330_v23, %v1280_v46 }
 0xef3   :  { %1285 = vst.msk [vmem:[%s1785_s13] sm:$0x7] %vm1284_vm0, %v1281_v47 }
 0xef8   :  { %v1282_v48 = vpop.f32.mrf.mxu1 }
 0xef9   :  { %1290 = vsyncpa [#allocation4], 1 }
 0xefa   :  { %1291 = vsyncpa [#allocation6], 1 }

</bundles_post_ra>
